<compile_context>
chip_gen: v7x
topology: tpu7x:2x2x1
jax: 0.10.0
libtpu: 0.0.40
codegen_flags: <defaults>
</compile_context>

<pallas_src>
import math

import jax
import jax.numpy as jnp
from jax import lax
from jax.experimental import pallas as pl
from jax.experimental.pallas import tpu as pltpu


NUM_CLASSES = 10
N_PAD = 128                       # lane-dense padded width of the last layer
DIMS = [784, 512, 256, 128, NUM_CLASSES]


def _mlp_kernel(x_ref,
                w1_ref, b1_ref,
                w2_ref, b2_ref,
                w3_ref, b3_ref,
                w4_ref, b4_ref,
                o_ref):
    """One batch tile: 4 matmuls (bf16 in, f32 acc) + ReLU + masked softmax."""
    x = x_ref[...].astype(jnp.bfloat16)

    # fc1 + relu
    h = jnp.dot(x, w1_ref[...], preferred_element_type=jnp.float32) + b1_ref[...]
    h = jnp.maximum(h, 0.0)

    # fc2 + relu
    h = jnp.dot(h.astype(jnp.bfloat16), w2_ref[...],
                preferred_element_type=jnp.float32) + b2_ref[...]
    h = jnp.maximum(h, 0.0)

    # fc3 + relu
    h = jnp.dot(h.astype(jnp.bfloat16), w3_ref[...],
                preferred_element_type=jnp.float32) + b3_ref[...]
    h = jnp.maximum(h, 0.0)

    # fc4 (padded to 128 lanes) + softmax(dim=1) over the real 10 classes only
    logits = jnp.dot(h.astype(jnp.bfloat16), w4_ref[...],
                     preferred_element_type=jnp.float32) + b4_ref[...]
    lane = lax.broadcasted_iota(jnp.int32, logits.shape, 1)
    logits = jnp.where(lane < NUM_CLASSES, logits, -jnp.inf)

    m = jnp.max(logits, axis=-1, keepdims=True)
    e = jnp.exp(logits - m)                      # padded lanes -> exp(-inf)=0
    denom = jnp.sum(e, axis=-1, keepdims=True)
    o_ref[...] = (e * pl.reciprocal(denom, approx=False)).astype(o_ref.dtype)


def digit_recognition_forward(x, params):
    """x: (B, 1, 28, 28) or (B, 784). params: dict (bf16 weights, f32 biases)."""
    b = x.shape[0]
    x2d = x.reshape(b, -1).astype(jnp.float32)   # == x.view(x.shape[0], -1)
    assert x2d.shape[1] == DIMS[0]

    w1, b1 = params["w1"], params["b1"]
    w2, b2 = params["w2"], params["b2"]
    w3, b3 = params["w3"], params["b3"]
    w4, b4 = params["w4"], params["b4"]          # w4: (128, 128), b4: (1, 128)

    # Batch tile: 256 rows (MXU-friendly M) when the batch is large, otherwise
    # the whole batch in one tile (block == full dim is always legal).
    tb = 256 if b >= 256 else b
    nb = pl.cdiv(b, tb)

    def resident(shape):
        # Whole array, same block every grid step -> loaded once, stays in VMEM.
        return pl.BlockSpec(shape, lambda i: tuple(0 for _ in shape))

    out_padded = pl.pallas_call(
        _mlp_kernel,
        out_shape=jax.ShapeDtypeStruct((b, N_PAD), jnp.float32),
        grid=(nb,),
        in_specs=[
            pl.BlockSpec((tb, DIMS[0]), lambda i: (i, 0)),   # x: batch-tiled
            resident(w1.shape), resident(b1.shape),
            resident(w2.shape), resident(b2.shape),
            resident(w3.shape), resident(b3.shape),
            resident(w4.shape), resident(b4.shape),
        ],
        out_specs=pl.BlockSpec((tb, N_PAD), lambda i: (i, 0)),
        compiler_params=pltpu.CompilerParams(
            dimension_semantics=("parallel",)),
    )(x2d, w1, b1, w2, b2, w3, b3, w4, b4)

    # Drop the zero-padded class lanes (free layout plumbing in the wrapper).
    return out_padded[:, :NUM_CLASSES]


def init_params(key):
    """nn.Linear-style init: U(-1/sqrt(fan_in), +1/sqrt(fan_in)).
    Weights stored (in, out) in bf16; biases (1, out) in f32.
    The last layer is zero-padded from 10 to 128 output lanes."""
    params = {}
    for i in range(4):
        fan_in, fan_out = DIMS[i], DIMS[i + 1]
        key, kw, kb = jax.random.split(key, 3)
        bound = 1.0 / math.sqrt(fan_in)
        w = jax.random.uniform(kw, (fan_in, fan_out), jnp.float32,
                               minval=-bound, maxval=bound)
        bvec = jax.random.uniform(kb, (1, fan_out), jnp.float32,
                                  minval=-bound, maxval=bound)
        if i == 3:  # pad last layer to a lane-dense width
            w = jnp.pad(w, ((0, 0), (0, N_PAD - fan_out)))
            bvec = jnp.pad(bvec, ((0, 0), (0, N_PAD - fan_out)))
        params[f"w{i + 1}"] = w.astype(jnp.bfloat16)
        params[f"b{i + 1}"] = bvec
    return params


def reference_forward(x, params):
    """Plain-JAX reference with identical numerics (bf16 dot inputs, f32 acc)."""
    b = x.shape[0]
    h = x.reshape(b, -1).astype(jnp.float32)

    def lin(h, w, bvec):
        return jnp.dot(h.astype(jnp.bfloat16), w,
                       preferred_element_type=jnp.float32) + bvec

    h = jnp.maximum(lin(h, params["w1"], params["b1"]), 0.0)
    h = jnp.maximum(lin(h, params["w2"], params["b2"]), 0.0)
    h = jnp.maximum(lin(h, params["w3"], params["b3"]), 0.0)
    logits = lin(h, params["w4"], params["b4"])[:, :NUM_CLASSES]
    return jax.nn.softmax(logits, axis=1)


if __name__ == "__main__":
    key = jax.random.PRNGKey(0)
    k_params, k_x1, k_x2 = jax.random.split(key, 3)

    params = init_params(k_params)

    # Small MNIST-like NCHW input (batch=2): single tile.
    x_small = jax.random.normal(k_x1, (2, 1, 28, 28), dtype=jnp.float32)
    out_small = jax.block_until_ready(digit_recognition_forward(x_small, params))
    ref_small = jax.block_until_ready(reference_forward(x_small, params))
    assert out_small.shape == (2, NUM_CLASSES)
    assert jnp.allclose(out_small, ref_small, atol=1e-3, rtol=1e-3)
    assert jnp.allclose(jnp.sum(out_small, axis=1), 1.0, atol=1e-3)

    # Larger batch: exercises the batch grid (2 tiles, partial last tile).
    x_big = jax.random.normal(k_x2, (384, 1, 28, 28), dtype=jnp.float32)
    out_big = jax.block_until_ready(digit_recognition_forward(x_big, params))
    ref_big = jax.block_until_ready(reference_forward(x_big, params))
    assert out_big.shape == (384, NUM_CLASSES)
    assert jnp.allclose(out_big, ref_big, atol=1e-3, rtol=1e-3)
    assert jnp.allclose(jnp.sum(out_big, axis=1), 1.0, atol=1e-3)

    print("KERNEL_OK")
</pallas_src>

<mosaic_0001>
module attributes {stable_mosaic.version = 11 : i64} {
  func.func @_mlp_kernel(%arg0: i32, %arg1: memref<2x784xf32, #tpu.memory_space<vmem>>, %arg2: memref<784x512xbf16, #tpu.memory_space<vmem>>, %arg3: memref<1x512xf32, #tpu.memory_space<vmem>>, %arg4: memref<512x256xbf16, #tpu.memory_space<vmem>>, %arg5: memref<1x256xf32, #tpu.memory_space<vmem>>, %arg6: memref<256x128xbf16, #tpu.memory_space<vmem>>, %arg7: memref<1x128xf32, #tpu.memory_space<vmem>>, %arg8: memref<128x128xbf16, #tpu.memory_space<vmem>>, %arg9: memref<1x128xf32, #tpu.memory_space<vmem>>, %arg10: memref<2x128xf32, #tpu.memory_space<vmem>>) attributes {dimension_semantics = [#tpu.dimension_semantics<parallel>], iteration_bounds = array<i64: 1>, scalar_prefetch = 0 : i64, scratch_operands = 0 : i64, tpu.core_type = #tpu.core_type<tc>, window_params = [{transform_indices = @transform_0, window_bounds = array<i64: 2, 784>}, {pipeline_mode = #tpu.pipeline_mode<synchronous>, transform_indices = @transform_1, window_bounds = array<i64: 784, 512>}, {pipeline_mode = #tpu.pipeline_mode<synchronous>, transform_indices = @transform_2, window_bounds = array<i64: 1, 512>}, {pipeline_mode = #tpu.pipeline_mode<synchronous>, transform_indices = @transform_3, window_bounds = array<i64: 512, 256>}, {pipeline_mode = #tpu.pipeline_mode<synchronous>, transform_indices = @transform_4, window_bounds = array<i64: 1, 256>}, {pipeline_mode = #tpu.pipeline_mode<synchronous>, transform_indices = @transform_5, window_bounds = array<i64: 256, 128>}, {pipeline_mode = #tpu.pipeline_mode<synchronous>, transform_indices = @transform_6, window_bounds = array<i64: 1, 128>}, {pipeline_mode = #tpu.pipeline_mode<synchronous>, transform_indices = @transform_7, window_bounds = array<i64: 128, 128>}, {pipeline_mode = #tpu.pipeline_mode<synchronous>, transform_indices = @transform_8, window_bounds = array<i64: 1, 128>}, {transform_indices = @transform_9, window_bounds = array<i64: 2, 128>}]} {
    %c0 = arith.constant 0 : index
    %c0_0 = arith.constant 0 : index
    %0 = vector.load %arg1[%c0, %c0_0] : memref<2x784xf32, #tpu.memory_space<vmem>>, vector<2x784xf32>
    %1 = arith.truncf %0 : vector<2x784xf32> to vector<2x784xbf16>
    %c0_1 = arith.constant 0 : index
    %c0_2 = arith.constant 0 : index
    %2 = vector.load %arg2[%c0_1, %c0_2] : memref<784x512xbf16, #tpu.memory_space<vmem>>, vector<784x512xbf16>
    %cst = arith.constant dense<0.000000e+00> : vector<2x512xf32>
    %3 = tpu.matmul %1, %2, %cst {dimension_numbers = #tpu.dot_dimension_numbers<[1], [0], [0], [1], [0, 0, 1, 1], [], []>} : vector<2x784xbf16>, vector<784x512xbf16>, vector<2x512xf32> -> vector<2x512xf32>
    %c0_3 = arith.constant 0 : index
    %c0_4 = arith.constant 0 : index
    %4 = vector.load %arg3[%c0_3, %c0_4] : memref<1x512xf32, #tpu.memory_space<vmem>>, vector<1x512xf32>
    %5 = vector.broadcast %4 : vector<1x512xf32> to vector<2x512xf32>
    %6 = arith.addf %3, %5 : vector<2x512xf32>
    %cst_5 = arith.constant 0.000000e+00 : f32
    %7 = vector.broadcast %cst_5 : f32 to vector<2x512xf32>
    %8 = arith.maximumf %6, %7 : vector<2x512xf32>
    %9 = arith.truncf %8 : vector<2x512xf32> to vector<2x512xbf16>
    %c0_6 = arith.constant 0 : index
    %c0_7 = arith.constant 0 : index
    %10 = vector.load %arg4[%c0_6, %c0_7] : memref<512x256xbf16, #tpu.memory_space<vmem>>, vector<512x256xbf16>
    %cst_8 = arith.constant dense<0.000000e+00> : vector<2x256xf32>
    %11 = tpu.matmul %9, %10, %cst_8 {dimension_numbers = #tpu.dot_dimension_numbers<[1], [0], [0], [1], [0, 0, 1, 1], [], []>} : vector<2x512xbf16>, vector<512x256xbf16>, vector<2x256xf32> -> vector<2x256xf32>
    %c0_9 = arith.constant 0 : index
    %c0_10 = arith.constant 0 : index
    %12 = vector.load %arg5[%c0_9, %c0_10] : memref<1x256xf32, #tpu.memory_space<vmem>>, vector<1x256xf32>
    %13 = vector.broadcast %12 : vector<1x256xf32> to vector<2x256xf32>
    %14 = arith.addf %11, %13 : vector<2x256xf32>
    %cst_11 = arith.constant 0.000000e+00 : f32
    %15 = vector.broadcast %cst_11 : f32 to vector<2x256xf32>
    %16 = arith.maximumf %14, %15 : vector<2x256xf32>
    %17 = arith.truncf %16 : vector<2x256xf32> to vector<2x256xbf16>
    %c0_12 = arith.constant 0 : index
    %c0_13 = arith.constant 0 : index
    %18 = vector.load %arg6[%c0_12, %c0_13] : memref<256x128xbf16, #tpu.memory_space<vmem>>, vector<256x128xbf16>
    %cst_14 = arith.constant dense<0.000000e+00> : vector<2x128xf32>
    %19 = tpu.matmul %17, %18, %cst_14 {dimension_numbers = #tpu.dot_dimension_numbers<[1], [0], [0], [1], [0, 0, 1, 1], [], []>} : vector<2x256xbf16>, vector<256x128xbf16>, vector<2x128xf32> -> vector<2x128xf32>
    %c0_15 = arith.constant 0 : index
    %c0_16 = arith.constant 0 : index
    %20 = vector.load %arg7[%c0_15, %c0_16] : memref<1x128xf32, #tpu.memory_space<vmem>>, vector<1x128xf32>
    %21 = vector.broadcast %20 : vector<1x128xf32> to vector<2x128xf32>
    %22 = arith.addf %19, %21 : vector<2x128xf32>
    %cst_17 = arith.constant 0.000000e+00 : f32
    %23 = vector.broadcast %cst_17 : f32 to vector<2x128xf32>
    %24 = arith.maximumf %22, %23 : vector<2x128xf32>
    %25 = arith.truncf %24 : vector<2x128xf32> to vector<2x128xbf16>
    %c0_18 = arith.constant 0 : index
    %c0_19 = arith.constant 0 : index
    %26 = vector.load %arg8[%c0_18, %c0_19] : memref<128x128xbf16, #tpu.memory_space<vmem>>, vector<128x128xbf16>
    %cst_20 = arith.constant dense<0.000000e+00> : vector<2x128xf32>
    %27 = tpu.matmul %25, %26, %cst_20 {dimension_numbers = #tpu.dot_dimension_numbers<[1], [0], [0], [1], [0, 0, 1, 1], [], []>} : vector<2x128xbf16>, vector<128x128xbf16>, vector<2x128xf32> -> vector<2x128xf32>
    %c0_21 = arith.constant 0 : index
    %c0_22 = arith.constant 0 : index
    %28 = vector.load %arg9[%c0_21, %c0_22] : memref<1x128xf32, #tpu.memory_space<vmem>>, vector<1x128xf32>
    %29 = vector.broadcast %28 : vector<1x128xf32> to vector<2x128xf32>
    %30 = arith.addf %27, %29 : vector<2x128xf32>
    %31 = tpu.iota {dimensions = array<i32: 1>} : vector<2x128xi32>
    %c10_i32 = arith.constant 10 : i32
    %32 = vector.broadcast %c10_i32 : i32 to vector<2x128xi32>
    %33 = arith.cmpi slt, %31, %32 : vector<2x128xi32>
    %cst_23 = arith.constant 0xFF800000 : f32
    %34 = vector.broadcast %cst_23 : f32 to vector<2x128xf32>
    %35 = arith.select %33, %30, %34 : vector<2x128xi1>, vector<2x128xf32>
    %cst_24 = arith.constant dense<0xFF800000> : vector<2xf32>
    %36 = vector.multi_reduction <maximumf>, %35, %cst_24 [1] : vector<2x128xf32> to vector<2xf32>
    %37 = vector.shape_cast %36 : vector<2xf32> to vector<2x1xf32>
    %38 = vector.broadcast %37 : vector<2x1xf32> to vector<2x128xf32>
    %39 = arith.subf %35, %38 : vector<2x128xf32>
    %40 = math.exp %39 : vector<2x128xf32>
    %cst_25 = arith.constant dense<0.000000e+00> : vector<2xf32>
    %41 = vector.multi_reduction <add>, %40, %cst_25 [1] : vector<2x128xf32> to vector<2xf32>
    %42 = vector.shape_cast %41 : vector<2xf32> to vector<2x1xf32>
    %43 = tpu.reciprocal %42 : vector<2x1xf32> -> vector<2x1xf32>
    %44 = vector.broadcast %43 : vector<2x1xf32> to vector<2x128xf32>
    %45 = arith.mulf %40, %44 : vector<2x128xf32>
    %c0_26 = arith.constant 0 : index
    %c0_27 = arith.constant 0 : index
    %46 = vector.load %arg10[%c0_26, %c0_27] : memref<2x128xf32, #tpu.memory_space<vmem>>, vector<2x128xf32>
    tpu.vector_store %arg10[%c0_26, %c0_27], %45 {strides = array<i32>} : memref<2x128xf32, #tpu.memory_space<vmem>>, vector<2x128xf32>,
    return
  }
  func.func @transform_0(%arg0: i32) -> (i32, i32) {
    %c0_i32 = arith.constant 0 : i32
    %c0_i32_0 = arith.constant 0 : i32
    return %arg0, %c0_i32 : i32, i32
  }
  func.func @transform_1(%arg0: i32) -> (i32, i32) {
    %c0_i32 = arith.constant 0 : i32
    %c0_i32_0 = arith.constant 0 : i32
    %c0_i32_1 = arith.constant 0 : i32
    return %c0_i32, %c0_i32_0 : i32, i32
  }
  func.func @transform_2(%arg0: i32) -> (i32, i32) {
    %c0_i32 = arith.constant 0 : i32
    %c0_i32_0 = arith.constant 0 : i32
    %c0_i32_1 = arith.constant 0 : i32
    return %c0_i32, %c0_i32_0 : i32, i32
  }
  func.func @transform_3(%arg0: i32) -> (i32, i32) {
    %c0_i32 = arith.constant 0 : i32
    %c0_i32_0 = arith.constant 0 : i32
    %c0_i32_1 = arith.constant 0 : i32
    return %c0_i32, %c0_i32_0 : i32, i32
  }
  func.func @transform_4(%arg0: i32) -> (i32, i32) {
    %c0_i32 = arith.constant 0 : i32
    %c0_i32_0 = arith.constant 0 : i32
    %c0_i32_1 = arith.constant 0 : i32
    return %c0_i32, %c0_i32_0 : i32, i32
  }
  func.func @transform_5(%arg0: i32) -> (i32, i32) {
    %c0_i32 = arith.constant 0 : i32
    %c0_i32_0 = arith.constant 0 : i32
    %c0_i32_1 = arith.constant 0 : i32
    return %c0_i32, %c0_i32_0 : i32, i32
  }
  func.func @transform_6(%arg0: i32) -> (i32, i32) {
    %c0_i32 = arith.constant 0 : i32
    %c0_i32_0 = arith.constant 0 : i32
    %c0_i32_1 = arith.constant 0 : i32
    return %c0_i32, %c0_i32_0 : i32, i32
  }
  func.func @transform_7(%arg0: i32) -> (i32, i32) {
    %c0_i32 = arith.constant 0 : i32
    %c0_i32_0 = arith.constant 0 : i32
    %c0_i32_1 = arith.constant 0 : i32
    return %c0_i32, %c0_i32_0 : i32, i32
  }
  func.func @transform_8(%arg0: i32) -> (i32, i32) {
    %c0_i32 = arith.constant 0 : i32
    %c0_i32_0 = arith.constant 0 : i32
    %c0_i32_1 = arith.constant 0 : i32
    return %c0_i32, %c0_i32_0 : i32, i32
  }
  func.func @transform_9(%arg0: i32) -> (i32, i32) {
    %c0_i32 = arith.constant 0 : i32
    %c0_i32_0 = arith.constant 0 : i32
    return %arg0, %c0_i32 : i32, i32
  }
}

</mosaic_0001>

<bundles_post_ra>
// kernel: tpu_custom_call.1
= control target key start
LH: loop header
LB: loop body
LE: loop exit
PB: predicated region body
PF: predicated region fallthrough
CT: control target
= control target key end

     0   :  { %14 = vsyncpa [#allocation3], 0  ;;  %s3663_s0 = inlined_call_operand.hbm [shape: f32[2,784], index: 0, kind: input, shape index: {}]   ;;  %s3664_s1 = inlined_call_operand.hbm [shape: bf16[784,512], index: 1, kind: input, shape index: {}]   ;;  %s3665_s2 = inlined_call_operand.vmem [shape: f32[1,512], index: 2, kind: input, shape index: {}]   ;;  %s3666_s3 = inlined_call_operand.hbm [shape: bf16[512,256], index: 3, kind: input, shape index: {}]   ;;  %s3667_s4 = inlined_call_operand.vmem [shape: f32[1,256], index: 4, kind: input, shape index: {}]   ;;  %s3668_s5 = inlined_call_operand.hbm [shape: bf16[256,128], index: 5, kind: input, shape index: {}]   ;;  %s3669_s6 = inlined_call_operand.vmem [shape: f32[1,128], index: 6, kind: input, shape index: {}]   ;;  %s3670_s7 = inlined_call_operand.hbm [shape: bf16[128,128], index: 7, kind: input, shape index: {}]   ;;  %s3671_s8 = inlined_call_operand.vmem [shape: f32[1,128], index: 8, kind: input, shape index: {}]   ;;  %s3672_s9 = inlined_call_operand.hbm [shape: f32[2,128], index: 9, kind: output, shape index: {}]  }
   0x1   :  { %15 = vsyncpa [#allocation6], 0 }
   0x2   :  { %16 = vsyncpa [#allocation9], 0 }
   0x3   :  { %17 = vsyncpa [#allocation4], 0  ;;  %s3440_s30 = smov [#allocation5]   ;;  %s3300_s13 = scalar_lea.hbm %s3664_s1, 25088 }
   0x4   :  { %s33_s10 = sshll.u32 %s3440_s30, 4  ;;  %p3301_p0 = scmp.ne.s32.totalorder %s3664_s1, %s3300_s13  ;;  %s34_s10 = int_to_ptr.vmem [resolvable:$true] %s33_s10 }
   0x5   :  { %p3304_p1 = scmp.lt.u32.totalorder %s3300_s13, %s3664_s1 }
   0x7   :  { %p3306_p2 = pnand %p3304_p1, %p3301_p0 }
   0x9   :  { %3309 = shalt.err (!%p3306_p2)
}
   0xa   :  { %s3310_s18 = scalar_lea.vmem %s34_s10, 25088  ;;  %p3315_p4 = scmp.lt.s32.totalorder %s34_s10, %s34_s10 }
   0xb   :  { %p3311_p3 = scmp.ne.s32.totalorder %s34_s10, %s3310_s18  ;;  %p3316_p5 = scmp.lt.s32.totalorder %s3310_s18, %s3310_s18 }
   0xd   :  { %p3317_p6 = por %p3316_p5, %p3315_p4 }
   0xf   :  { %p3318_p7 = pnand %p3317_p6, %p3311_p3 }
  0x11   :  { %3321 = shalt.err (!%p3318_p7)
}
  0x12   :  { %s3441_s19 = smov 256   ;;  %s3442_s20 = smov 16  }
  0x13   :  { %39 = dma.hbm_to_vmem [thread:$0]  %s3664_s1, 25088, %s34_s10, [#allocation6], %s3441_s19, %s3441_s19, %s3442_s20  }
  0x14   :  { %s3443_s23 = smov [#allocation8]   ;;  %s3322_s27 = scalar_lea.hbm %s3668_s5, 2048 }
  0x15   :  { %s61_s24 = sshll.u32 %s3443_s23, 4  ;;  %p3323_p8 = scmp.ne.s32.totalorder %s3668_s5, %s3322_s27  ;;  %s62_s24 = int_to_ptr.vmem [resolvable:$true] %s61_s24 }
  0x16   :  { %p3326_p9 = scmp.lt.u32.totalorder %s3322_s27, %s3668_s5 }
  0x18   :  { %p3328_p10 = pnand %p3326_p9, %p3323_p8 }
  0x1a   :  { %3331 = shalt.err (!%p3328_p10)
}
  0x1b   :  { %s3332_s12 = scalar_lea.vmem %s62_s24, 2048  ;;  %p3337_p12 = scmp.lt.s32.totalorder %s62_s24, %s62_s24 }
  0x1c   :  { %p3333_p11 = scmp.ne.s32.totalorder %s62_s24, %s3332_s12  ;;  %p3338_p13 = scmp.lt.s32.totalorder %s3332_s12, %s3332_s12 }
  0x1e   :  { %p3339_p0 = por %p3338_p13, %p3337_p12 }
  0x20   :  { %p3340_p1 = pnand %p3339_p0, %p3333_p11 }
  0x22   :  { %3343 = shalt.err (!%p3340_p1)
}
  0x23   :  { %s3444_s1 = smov 64   ;;  %s3445_s10 = smov 4  }
  0x24   :  { %67 = dma.hbm_to_vmem [thread:$0]  %s3668_s5, 2048, %s62_s24, [#allocation9], %s3444_s1, %s3444_s1, %s3445_s10  }
  0x25   :  { %s3446_s15 = smov [#allocation2]   ;;  %s3447_s17 = smov [#allocation7]  }
  0x26   :  { %s24_s16 = sshll.u32 %s3446_s15, 4  ;;  %s47_s18 = sshll.u32 %s3447_s17, 4  ;;  %s25_s16 = int_to_ptr.vmem [resolvable:$true] %s24_s16  ;;  %s3533_s18 = int_to_ptr.vmem [resolvable:$true] %s47_s18 }
  0x27   :  { %s3344_s21 = scalar_lea.hbm %s3663_s0, 224 }
  0x28   :  { %p3345_p2 = scmp.ne.s32.totalorder %s3663_s0, %s3344_s21  ;;  %p3348_p3 = scmp.lt.u32.totalorder %s3344_s21, %s3663_s0 }
  0x2a   :  { %p3350_p4 = pnand %p3348_p3, %p3345_p2 }
  0x2c   :  { %3353 = shalt.err (!%p3350_p4)
}
  0x2d   :  { %s3354_s5 = scalar_lea.vmem %s25_s16, 224  ;;  %p3359_p6 = scmp.lt.s32.totalorder %s25_s16, %s25_s16 }
  0x2e   :  { %p3355_p5 = scmp.ne.s32.totalorder %s25_s16, %s3354_s5  ;;  %p3360_p7 = scmp.lt.s32.totalorder %s3354_s5, %s3354_s5 }
  0x30   :  { %p3361_p8 = por %p3360_p7, %p3359_p6 }
  0x32   :  { %p3362_p9 = pnand %p3361_p8, %p3355_p5 }
  0x34   :  { %3365 = shalt.err (!%p3362_p9)
}
  0x35   :  { %27 = dma.hbm_to_vmem [thread:$0]  %s3663_s0, 224, %s25_s16, [#allocation3]  }
  0x36   :  { %s3366_s30 = scalar_lea.hbm %s3666_s3, 8192 }
  0x37   :  { %p3367_p10 = scmp.ne.s32.totalorder %s3666_s3, %s3366_s30  ;;  %p3370_p11 = scmp.lt.u32.totalorder %s3366_s30, %s3666_s3 }
  0x39   :  { %p3372_p12 = pnand %p3370_p11, %p3367_p10 }
  0x3b   :  { %3375 = shalt.err (!%p3372_p12)
}
  0x3c   :  { %s3376_s15 = scalar_lea.vmem %s3533_s18, 8192  ;;  %p3381_p0 = scmp.lt.s32.totalorder %s3533_s18, %s3533_s18 }
  0x3d   :  { %p3377_p13 = scmp.ne.s32.totalorder %s3533_s18, %s3376_s15  ;;  %p3382_p1 = scmp.lt.s32.totalorder %s3376_s15, %s3376_s15 }
  0x3f   :  { %p3383_p2 = por %p3382_p1, %p3381_p0 }
  0x41   :  { %p3384_p3 = pnand %p3383_p2, %p3377_p13 }
  0x43   :  { %3387 = shalt.err (!%p3384_p3)
}
  0x44   :  { %s3448_s0 = smov 128   ;;  %s3449_s16 = smov 8  }
  0x45   :  { %53 = dma.hbm_to_vmem [thread:$0]  %s3666_s3, 8192, %s3533_s18, [#allocation6], %s3448_s0, %s3448_s0, %s3449_s16  }
  0x46   :  { %s3450_s20 = smov [#allocation10]   ;;  %s3388_s25 = scalar_lea.hbm %s3670_s7, 1024 }
  0x47   :  { %s75_s21 = sshll.u32 %s3450_s20, 4  ;;  %p3389_p4 = scmp.ne.s32.totalorder %s3670_s7, %s3388_s25  ;;  %s76_s21 = int_to_ptr.vmem [resolvable:$true] %s75_s21 }
  0x48   :  { %p3392_p5 = scmp.lt.u32.totalorder %s3388_s25, %s3670_s7 }
  0x4a   :  { %p3394_p6 = pnand %p3392_p5, %p3389_p4 }
  0x4c   :  { %3397 = shalt.err (!%p3394_p6)
}
  0x4d   :  { %s3398_s28 = scalar_lea.vmem %s76_s21, 1024  ;;  %p3403_p8 = scmp.lt.s32.totalorder %s76_s21, %s76_s21 }
  0x4e   :  { %p3399_p7 = scmp.ne.s32.totalorder %s76_s21, %s3398_s28  ;;  %p3404_p9 = scmp.lt.s32.totalorder %s3398_s28, %s3398_s28 }
  0x50   :  { %p3405_p10 = por %p3404_p9, %p3403_p8 }
  0x52   :  { %p3406_p11 = pnand %p3405_p10, %p3399_p7 }
  0x54   :  { %3409 = shalt.err (!%p3406_p11)
}
  0x55   :  { %81 = dma.hbm_to_vmem [thread:$0]  %s3670_s7, 1024, %s76_s21, [#allocation9], %s3444_s1, %s3444_s1, %s3445_s10  }
  0x56   :  { %3432 = dma.done.wait [#allocation3], 224  }
  0x57   :  { %3433 = vsyncadd [#allocation3], 4294967072 }
  0x58   :  { %3434 = dma.done.wait [#allocation6], 33280  }
  0x59   :  { %3435 = vsyncadd [#allocation6], 4294934016 }
  0x5a   :  { %3436 = dma.done.wait [#allocation9], 3072  }
  0x5b   :  { %3437 = vsyncadd [#allocation9], 4294964224  ;;  %v3451_v0 = vmov 0   ;;  %v3452_v1 = vmov 1983009808   ;;  %v108_v3 = vlaneseq  ;;  %vm1349_vm0 = vcmask 130048  }
  0x5c   :  { %1508 = vmatprep.mubr.bf16.mxu1 %v3451_v0  ;;  %v106_v2 = vunpack.c.l.s4 %v3452_v1  ;;  %v2880_v4 = vld [vmem:[#allocation5 + $0x4] ss:$16 sps:$4 sm:$0xff]   ;;  %v2884_v8 = vld [vmem:[#allocation5] ss:$16 sps:$4 sm:$0xff]   ;;  %v2890_v11 = vld [vmem:[#allocation5 + $0xc] ss:$16 sps:$4 sm:$0xff]  }
  0x5d   :  { %v3581_v6 = vshrl.u32 %v108_v3, 7  ;;  %v2882_v7 = vld [vmem:[#allocation5 + $0x604] ss:$16 sps:$4 sm:$0xff]   ;;  %1353 = vmatprep.subr.bf16.mxu0 %v2880_v4  ;;  %v2885_v9 = vld [vmem:[#allocation5 + $0x600] ss:$16 sps:$4 sm:$0xff]   ;;  %vm3454_vm1 = vmmov 0  }
  0x5e   :  { %v107_v5 = vunpack.c.0.s8 %v106_v2  ;;  %1476 = vmatprep.subr.bf16.mxu1 %v2882_v7  ;;  %v2886_v10 = vld [vmem:[#allocation5 + $0x24] ss:$16 sps:$4 sm:$0xff]   ;;  %1354 = vmatpush1.bf16.msra.mxu0 %v2884_v8  ;;  %v2891_v13 = vld [vmem:[#allocation5 + $0x20] ss:$16 sps:$4 sm:$0xff]   ;;  %v3586_v14 = vld [vmem:[#allocation2 + $0x8] sm:$0x3f] }
  0x5f   :  { %1477 = vmatpush1.bf16.msra.mxu1 %v2885_v9  ;;  %1355 = vmatprep.subr.bf16.mxu0 %v2886_v10  ;;  %v121_v15 = vcombine.high %v3586_v14, %v3586_v14  ;;  %v2893_v16 = vld [vmem:[#allocation5 + $0x44] ss:$16 sps:$4 sm:$0xff]   ;;  %v2888_v17 = vld [vmem:[#allocation5 + $0x8] ss:$16 sps:$4 sm:$0xff]   ;;  %v2898_v19 = vld [vmem:[#allocation5 + $0x40] ss:$16 sps:$4 sm:$0xff]  }
  0x60   :  { %v3584_v12 = vsub.s32 %v107_v5, %v3581_v6  ;;  %1517 = vmatprep.subr.bf16.mxu1 %v2890_v11  ;;  %v2899_v20 = vld [vmem:[#allocation5 + $0x64] ss:$16 sps:$4 sm:$0xff]   ;;  %v2897_v22 = vld [vmem:[#allocation5 + $0x2c] ss:$16 sps:$4 sm:$0xff]   ;;  %v2904_v23 = vld [vmem:[#allocation5 + $0x60] ss:$16 sps:$4 sm:$0xff]  }
  0x61   :  { %v2895_v24 = vld [vmem:[#allocation5 + $0x28] ss:$16 sps:$4 sm:$0xff]   ;;  %v2905_v25 = vld [vmem:[#allocation5 + $0x84] ss:$16 sps:$4 sm:$0xff]   ;;  %v2903_v26 = vld [vmem:[#allocation5 + $0x4c] ss:$16 sps:$4 sm:$0xff]  }
  0x62   :  { %1356 = vmatpush1.bf16.msra.mxu0 %v2891_v13  ;;  %v135_v18 = vrot.slane %v121_v15, %v3584_v12  ;;  %v2901_v27 = vld [vmem:[#allocation5 + $0x48] ss:$16 sps:$4 sm:$0xff]   ;;  %v2910_v28 = vld [vmem:[#allocation5 + $0x80] ss:$16 sps:$4 sm:$0xff]   ;;  %v2911_v29 = vld [vmem:[#allocation5 + $0xa4] ss:$16 sps:$4 sm:$0xff]  }
  0x63   :  { %1357 = vmatprep.subr.bf16.mxu0 %v2893_v16  ;;  %v2909_v30 = vld [vmem:[#allocation5 + $0x6c] ss:$16 sps:$4 sm:$0xff]   ;;  %v2916_v31 = vld [vmem:[#allocation5 + $0xa0] ss:$16 sps:$4 sm:$0xff]   ;;  %v2907_v32 = vld [vmem:[#allocation5 + $0x68] ss:$16 sps:$4 sm:$0xff]  }
  0x64   :  { %v3591_v21 = vpack.c.bf16 %v135_v18, %v135_v18  ;;  %v2917_v33 = vld [vmem:[#allocation5 + $0xc4] ss:$16 sps:$4 sm:$0xff]   ;;  %v2915_v34 = vld [vmem:[#allocation5 + $0x8c] ss:$16 sps:$4 sm:$0xff]   ;;  %v2913_v35 = vld [vmem:[#allocation5 + $0x88] ss:$16 sps:$4 sm:$0xff]  }
  0x65   :  { %v2922_v36 = vld [vmem:[#allocation5 + $0xc0] ss:$16 sps:$4 sm:$0xff]   ;;  %v2923_v37 = vld [vmem:[#allocation5 + $0xe4] ss:$16 sps:$4 sm:$0xff]   ;;  %v2921_v38 = vld [vmem:[#allocation5 + $0xac] ss:$16 sps:$4 sm:$0xff]  }
  0x66   :  { %2689 = vmatmul.mubr.msk.bf16.vlgmr.msra.gmra.mrb[0].mxu1 %vm1349_vm0, %v3591_v21  ;;  %1358 = vmatpush1.bf16.msra.mxu0 %v2898_v19  ;;  %v2928_v39 = vld [vmem:[#allocation5 + $0xe0] ss:$16 sps:$4 sm:$0xff]   ;;  %v2919_v40 = vld [vmem:[#allocation5 + $0xa8] ss:$16 sps:$4 sm:$0xff]   ;;  %v2929_v41 = vld [vmem:[#allocation5 + $0x104] ss:$16 sps:$4 sm:$0xff]  }
  0x67   :  { %1518 = vmatpush1.bf16.msra.mxu1 %v2888_v17  ;;  %1359 = vmatprep.subr.bf16.mxu0 %v2899_v20  ;;  %v2927_v42 = vld [vmem:[#allocation5 + $0xcc] ss:$16 sps:$4 sm:$0xff]   ;;  %v2925_v43 = vld [vmem:[#allocation5 + $0xc8] ss:$16 sps:$4 sm:$0xff]   ;;  %v2934_v44 = vld [vmem:[#allocation5 + $0x100] ss:$16 sps:$4 sm:$0xff]  }
  0x68   :  { %1519 = vmatprep.subr.bf16.mxu1 %v2897_v22  ;;  %v2935_v45 = vld [vmem:[#allocation5 + $0x124] ss:$16 sps:$4 sm:$0xff]   ;;  %v2933_v46 = vld [vmem:[#allocation5 + $0xec] ss:$16 sps:$4 sm:$0xff]   ;;  %v2940_v47 = vld [vmem:[#allocation5 + $0x120] ss:$16 sps:$4 sm:$0xff]  }
  0x69   :  { %v2931_v48 = vld [vmem:[#allocation5 + $0xe8] ss:$16 sps:$4 sm:$0xff]   ;;  %v2941_v49 = vld [vmem:[#allocation5 + $0x144] ss:$16 sps:$4 sm:$0xff]   ;;  %v2939_v50 = vld [vmem:[#allocation5 + $0x10c] ss:$16 sps:$4 sm:$0xff]  }
  0x6a   :  { %1360 = vmatpush1.bf16.msra.mxu0 %v2904_v23  ;;  %v2937_v51 = vld [vmem:[#allocation5 + $0x108] ss:$16 sps:$4 sm:$0xff]   ;;  %v2946_v52 = vld [vmem:[#allocation5 + $0x140] ss:$16 sps:$4 sm:$0xff]   ;;  %v2947_v53 = vld [vmem:[#allocation5 + $0x164] ss:$16 sps:$4 sm:$0xff]  }
  0x6b   :  { %1520 = vmatpush1.bf16.msra.mxu1 %v2895_v24  ;;  %1361 = vmatprep.subr.bf16.mxu0 %v2905_v25  ;;  %v2945_v54 = vld [vmem:[#allocation5 + $0x12c] ss:$16 sps:$4 sm:$0xff]   ;;  %v100_v55 = vld [vmem:[#allocation2] sm:$0xff]  ;;  %vm2463_vm3 = vcmask 1041408  }
  0x6c   :  { %1521 = vmatprep.subr.bf16.mxu1 %v2903_v26  ;;  %v2952_v56 = vld [vmem:[#allocation5 + $0x160] ss:$16 sps:$4 sm:$0xff]   ;;  %v111_v57 = vrot.slane %v100_v55, %v3584_v12  ;;  %v2943_v58 = vld [vmem:[#allocation5 + $0x128] ss:$16 sps:$4 sm:$0xff]   ;;  %v2953_v59 = vld [vmem:[#allocation5 + $0x184] ss:$16 sps:$4 sm:$0xff]   ;;  %v104_v7 = vcombine.high %v100_v55, %v100_v55 }
  0x6d   :  { %v2951_v60 = vld [vmem:[#allocation5 + $0x14c] ss:$16 sps:$4 sm:$0xff]   ;;  %v2958_v62 = vld [vmem:[#allocation5 + $0x180] ss:$16 sps:$4 sm:$0xff]   ;;  %v2949_v1 = vld [vmem:[#allocation5 + $0x148] ss:$16 sps:$4 sm:$0xff]  }
  0x6e   :  { %1362 = vmatpush1.bf16.msra.mxu0 %v2910_v28  ;;  %v119_v61 = vcombine.high %v111_v57, %v111_v57  ;;  %v2959_v2 = vld [vmem:[#allocation5 + $0x1a4] ss:$16 sps:$4 sm:$0xff]   ;;  %v2957_v4 = vld [vmem:[#allocation5 + $0x16c] ss:$16 sps:$4 sm:$0xff]   ;;  %v2964_v5 = vld [vmem:[#allocation5 + $0x1a0] ss:$16 sps:$4 sm:$0xff]   ;;  %v3597_v13 = vrot.slane %v104_v7, %v3584_v12  ;;  %v144_v24 = vpack.c.bf16 %v111_v57, %v111_v57 }
  0x6f   :  { %1522 = vmatpush1.bf16.msra.mxu1 %v2901_v27  ;;  %1363 = vmatprep.subr.bf16.mxu0 %v2911_v29  ;;  %v2955_v8 = vld [vmem:[#allocation5 + $0x168] ss:$16 sps:$4 sm:$0xff]   ;;  %v2965_v9 = vld [vmem:[#allocation5 + $0x1c4] ss:$16 sps:$4 sm:$0xff]   ;;  %v2963_v10 = vld [vmem:[#allocation5 + $0x18c] ss:$16 sps:$4 sm:$0xff]   ;;  %v3603_v29 = vrot.slane %v3586_v14, %v3584_v12 }
  0x70   :  { %1523 = vmatprep.subr.bf16.mxu1 %v2909_v30  ;;  %v145_v63 = vpack.c.bf16 %v119_v61, %v119_v61  ;;  %v2970_v11 = vld [vmem:[#allocation5 + $0x1c0] ss:$16 sps:$4 sm:$0xff]   ;;  %v2961_v15 = vld [vmem:[#allocation5 + $0x188] ss:$16 sps:$4 sm:$0xff]   ;;  %v2971_v16 = vld [vmem:[#allocation5 + $0x1e4] ss:$16 sps:$4 sm:$0xff]   ;;  %v120_v19 = vcombine.high %v3597_v13, %v3597_v13 }
  0x71   :  { %v2969_v17 = vld [vmem:[#allocation5 + $0x1ac] ss:$16 sps:$4 sm:$0xff]   ;;  %v2976_v18 = vld [vmem:[#allocation5 + $0x1e0] ss:$16 sps:$4 sm:$0xff]   ;;  %v2967_v20 = vld [vmem:[#allocation5 + $0x1a8] ss:$16 sps:$4 sm:$0xff]  }
  0x72   :  { %1364 = vmatpush1.bf16.msra.mxu0 %v2916_v31  ;;  %1385 = vmatprep.mubr.bf16.mxu0 %v145_v63  ;;  %v2980_v22 = vld [vmem:[#allocation5 + $0x204] ss:$16 sps:$4 sm:$0xff]   ;;  %v2975_v23 = vld [vmem:[#allocation5 + $0x1cc] ss:$16 sps:$4 sm:$0xff]   ;;  %v2978_v25 = vld [vmem:[#allocation5 + $0x200] ss:$16 sps:$4 sm:$0xff]   ;;  %v147_v26 = vpack.c.bf16 %v120_v19, %v120_v19 }
  0x73   :  { %1524 = vmatpush1.bf16.msra.mxu1 %v2907_v32  ;;  %1365 = vmatprep.subr.bf16.mxu0 %v2917_v33  ;;  %v2973_v27 = vld [vmem:[#allocation5 + $0x1c8] ss:$16 sps:$4 sm:$0xff]   ;;  %v2986_v28 = vld [vmem:[#allocation5 + $0x224] ss:$16 sps:$4 sm:$0xff]   ;;  %v2983_v30 = vld [vmem:[#allocation5 + $0x1ec] ss:$16 sps:$4 sm:$0xff]  }
  0x74   :  { %1525 = vmatprep.subr.bf16.mxu1 %v2915_v34  ;;  %1549 = vmatprep.mubr.bf16.mxu1 %v145_v63  ;;  %v2984_v31 = vld [vmem:[#allocation5 + $0x220] ss:$16 sps:$4 sm:$0xff]   ;;  %v2981_v32 = vld [vmem:[#allocation5 + $0x1e8] ss:$16 sps:$4 sm:$0xff]   ;;  %v2992_v33 = vld [vmem:[#allocation5 + $0x244] ss:$16 sps:$4 sm:$0xff]  }
  0x75   :  { %v2989_v34 = vld [vmem:[#allocation5 + $0x20c] ss:$16 sps:$4 sm:$0xff]   ;;  %v2996_v14 = vld [vmem:[#allocation5 + $0x260] ss:$16 sps:$4 sm:$0xff]   ;;  %v3028_v55 = vld [vmem:[#allocation5 + $0x304] ss:$16 sps:$4 sm:$0xff]  }
  0x76   :  { %1366 = vmatpush1.bf16.msra.mxu0 %v2922_v36  ;;  %v2987_v36 = vld [vmem:[#allocation5 + $0x208] ss:$16 sps:$4 sm:$0xff]   ;;  %v2995_v12 = vld [vmem:[#allocation5 + $0x22c] ss:$16 sps:$4 sm:$0xff]   ;;  %v3026_v57 = vld [vmem:[#allocation5 + $0x300] ss:$16 sps:$4 sm:$0xff]  }
  0x77   :  { %1526 = vmatpush1.bf16.msra.mxu1 %v2913_v35  ;;  %1367 = vmatprep.subr.bf16.mxu0 %v2923_v37  ;;  %v2990_v35 = vld [vmem:[#allocation5 + $0x240] ss:$16 sps:$4 sm:$0xff]   ;;  %v2998_v37 = vld [vmem:[#allocation5 + $0x264] ss:$16 sps:$4 sm:$0xff]   ;;  %v3043_v7 = vld [vmem:[#allocation5 + $0x32c] ss:$16 sps:$4 sm:$0xff]  }
  0x78   :  { %1527 = vmatprep.subr.bf16.mxu1 %v2921_v38  ;;  %v2993_v38 = vld [vmem:[#allocation5 + $0x228] ss:$16 sps:$4 sm:$0xff]   ;;  %v3032_v61 = vld [vmem:[#allocation5 + $0x320] ss:$16 sps:$4 sm:$0xff]   ;;  %v3040_v63 = vld [vmem:[#allocation5 + $0x344] ss:$16 sps:$4 sm:$0xff]  }
  0x79   :  { %v3056_v19 = vld [vmem:[#allocation5 + $0x3a0] ss:$16 sps:$4 sm:$0xff]  }
  0x7a   :  { %1368 = vmatpush1.bf16.msra.mxu0 %v2928_v39  ;;  %v3004_v39 = vld [vmem:[#allocation5 + $0x284] ss:$16 sps:$4 sm:$0xff]  }
  0x7b   :  { %1528 = vmatpush1.bf16.msra.mxu1 %v2919_v40  ;;  %1369 = vmatprep.subr.bf16.mxu0 %v2929_v41  ;;  %v3001_v40 = vld [vmem:[#allocation5 + $0x24c] ss:$16 sps:$4 sm:$0xff]   ;;  %v3002_v41 = vld [vmem:[#allocation5 + $0x280] ss:$16 sps:$4 sm:$0xff]  }
  0x7c   :  { %1529 = vmatprep.subr.bf16.mxu1 %v2927_v42  ;;  %v2999_v42 = vld [vmem:[#allocation5 + $0x248] ss:$16 sps:$4 sm:$0xff]  }
  0x7e   :  { %1370 = vmatpush1.bf16.msra.mxu0 %v2934_v44  ;;  %v3007_v44 = vld [vmem:[#allocation5 + $0x26c] ss:$16 sps:$4 sm:$0xff]  }
  0x7f   :  { %1530 = vmatpush1.bf16.msra.mxu1 %v2925_v43  ;;  %1371 = vmatprep.subr.bf16.mxu0 %v2935_v45  ;;  %v3010_v43 = vld [vmem:[#allocation5 + $0x2a4] ss:$16 sps:$4 sm:$0xff]   ;;  %v3008_v45 = vld [vmem:[#allocation5 + $0x2a0] ss:$16 sps:$4 sm:$0xff]  }
  0x80   :  { %1531 = vmatprep.subr.bf16.mxu1 %v2933_v46  ;;  %v3005_v46 = vld [vmem:[#allocation5 + $0x268] ss:$16 sps:$4 sm:$0xff]  }
  0x82   :  { %1372 = vmatpush1.bf16.msra.mxu0 %v2940_v47  ;;  %v3016_v47 = vld [vmem:[#allocation5 + $0x2c4] ss:$16 sps:$4 sm:$0xff]  }
  0x83   :  { %1532 = vmatpush1.bf16.msra.mxu1 %v2931_v48  ;;  %1373 = vmatprep.subr.bf16.mxu0 %v2941_v49  ;;  %v3013_v48 = vld [vmem:[#allocation5 + $0x28c] ss:$16 sps:$4 sm:$0xff]   ;;  %v3014_v49 = vld [vmem:[#allocation5 + $0x2c0] ss:$16 sps:$4 sm:$0xff]  }
  0x84   :  { %1533 = vmatprep.subr.bf16.mxu1 %v2939_v50  ;;  %v3011_v50 = vld [vmem:[#allocation5 + $0x288] ss:$16 sps:$4 sm:$0xff]  }
  0x86   :  { %1374 = vmatpush1.bf16.msra.mxu0 %v2946_v52  ;;  %v3019_v52 = vld [vmem:[#allocation5 + $0x2ac] ss:$16 sps:$4 sm:$0xff]  }
  0x87   :  { %1534 = vmatpush1.bf16.msra.mxu1 %v2937_v51  ;;  %1375 = vmatprep.subr.bf16.mxu0 %v2947_v53  ;;  %v3022_v51 = vld [vmem:[#allocation5 + $0x2e4] ss:$16 sps:$4 sm:$0xff]   ;;  %v3020_v53 = vld [vmem:[#allocation5 + $0x2e0] ss:$16 sps:$4 sm:$0xff]  }
  0x88   :  { %1535 = vmatprep.subr.bf16.mxu1 %v2945_v54  ;;  %v3017_v54 = vld [vmem:[#allocation5 + $0x2a8] ss:$16 sps:$4 sm:$0xff]  }
  0x8a   :  { %1376 = vmatpush1.bf16.msra.mxu0 %v2952_v56  ;;  %v3025_v56 = vld [vmem:[#allocation5 + $0x2cc] ss:$16 sps:$4 sm:$0xff]  }
  0x8b   :  { %1536 = vmatpush1.bf16.msra.mxu1 %v2943_v58  ;;  %1377 = vmatprep.subr.bf16.mxu0 %v2953_v59  ;;  %v3023_v58 = vld [vmem:[#allocation5 + $0x2c8] ss:$16 sps:$4 sm:$0xff]   ;;  %v3034_v59 = vld [vmem:[#allocation5 + $0x324] ss:$16 sps:$4 sm:$0xff]  }
  0x8c   :  { %1537 = vmatprep.subr.bf16.mxu1 %v2951_v60  ;;  %v3031_v60 = vld [vmem:[#allocation5 + $0x2ec] ss:$16 sps:$4 sm:$0xff]  }
  0x8e   :  { %1378 = vmatpush1.bf16.msra.mxu0 %v2958_v62  ;;  %v3029_v62 = vld [vmem:[#allocation5 + $0x2e8] ss:$16 sps:$4 sm:$0xff]  }
  0x8f   :  { %1538 = vmatpush1.bf16.msra.mxu1 %v2949_v1  ;;  %1379 = vmatprep.subr.bf16.mxu0 %v2959_v2  ;;  %v3037_v1 = vld [vmem:[#allocation5 + $0x30c] ss:$16 sps:$4 sm:$0xff]   ;;  %v3038_v2 = vld [vmem:[#allocation5 + $0x340] ss:$16 sps:$4 sm:$0xff]  }
  0x90   :  { %1539 = vmatprep.subr.bf16.mxu1 %v2957_v4  ;;  %v3035_v4 = vld [vmem:[#allocation5 + $0x308] ss:$16 sps:$4 sm:$0xff]  }
  0x92   :  { %1380 = vmatpush1.bf16.msra.mxu0 %v2964_v5  ;;  %v3046_v5 = vld [vmem:[#allocation5 + $0x364] ss:$16 sps:$4 sm:$0xff]  }
  0x93   :  { %1540 = vmatpush1.bf16.msra.mxu1 %v2955_v8  ;;  %1381 = vmatprep.subr.bf16.mxu0 %v2965_v9  ;;  %v3044_v8 = vld [vmem:[#allocation5 + $0x360] ss:$16 sps:$4 sm:$0xff]   ;;  %v3041_v9 = vld [vmem:[#allocation5 + $0x328] ss:$16 sps:$4 sm:$0xff]  }
  0x94   :  { %1541 = vmatprep.subr.bf16.mxu1 %v2963_v10  ;;  %v3052_v10 = vld [vmem:[#allocation5 + $0x384] ss:$16 sps:$4 sm:$0xff]  }
  0x96   :  { %1382 = vmatpush1.bf16.msra.mxu0 %v2970_v11  ;;  %v3049_v11 = vld [vmem:[#allocation5 + $0x34c] ss:$16 sps:$4 sm:$0xff]  }
  0x97   :  { %1542 = vmatpush1.bf16.msra.mxu1 %v2961_v15  ;;  %1383 = vmatprep.subr.bf16.mxu0 %v2971_v16  ;;  %v3050_v15 = vld [vmem:[#allocation5 + $0x380] ss:$16 sps:$4 sm:$0xff]   ;;  %v3047_v16 = vld [vmem:[#allocation5 + $0x348] ss:$16 sps:$4 sm:$0xff]  }
  0x98   :  { %1543 = vmatprep.subr.bf16.mxu1 %v2969_v17  ;;  %v3058_v17 = vld [vmem:[#allocation5 + $0x3a4] ss:$16 sps:$4 sm:$0xff]  }
  0x9a   :  { %1384 = vmatpush1.bf16.msra.mxu0 %v2976_v18  ;;  %v3055_v18 = vld [vmem:[#allocation5 + $0x36c] ss:$16 sps:$4 sm:$0xff]  }
  0x9b   :  { %1544 = vmatpush1.bf16.msra.mxu1 %v2967_v20  ;;  %1394 = vmatprep.subr.bf16.mxu0 %v2980_v22  ;;  %v3053_v20 = vld [vmem:[#allocation5 + $0x368] ss:$16 sps:$4 sm:$0xff]   ;;  %v3064_v22 = vld [vmem:[#allocation5 + $0x3c4] ss:$16 sps:$4 sm:$0xff]  }
  0x9c   :  { %1545 = vmatprep.subr.bf16.mxu1 %v2975_v23  ;;  %v3061_v23 = vld [vmem:[#allocation5 + $0x38c] ss:$16 sps:$4 sm:$0xff]  }
  0x9d   :  { %1386 = vmatmul.mubr.bf16.vlgmr.msra.gmra.mrb[0].mxu0 %v144_v24 }
  0x9e   :  { %1395 = vmatpush1.bf16.msra.mxu0 %v2978_v25  ;;  %1426 = vmatprep.mubr.bf16.mxu0 %v147_v26  ;;  %v3059_v25 = vld [vmem:[#allocation5 + $0x388] ss:$16 sps:$4 sm:$0xff]  }
  0x9f   :  { %1546 = vmatpush1.bf16.msra.mxu1 %v2973_v27  ;;  %1396 = vmatprep.subr.bf16.mxu0 %v2986_v28  ;;  %v3067_v27 = vld [vmem:[#allocation5 + $0x3ac] ss:$16 sps:$4 sm:$0xff]   ;;  %v3068_v28 = vld [vmem:[#allocation5 + $0x3e0] ss:$16 sps:$4 sm:$0xff]  }
  0xa0   :  { %1547 = vmatprep.subr.bf16.mxu1 %v2983_v30  ;;  %v136_v30 = vcombine.high %v3603_v29, %v3603_v29 }
  0xa2   :  { %1397 = vmatpush1.bf16.msra.mxu0 %v2984_v31  ;;  %v3065_v31 = vld [vmem:[#allocation5 + $0x3a8] ss:$16 sps:$4 sm:$0xff]  }
  0xa3   :  { %1548 = vmatpush1.bf16.msra.mxu1 %v2981_v32  ;;  %1398 = vmatprep.subr.bf16.mxu0 %v2992_v33  ;;  %v3076_v32 = vld [vmem:[#allocation5 + $0x404] ss:$16 sps:$4 sm:$0xff]   ;;  %v3073_v33 = vld [vmem:[#allocation5 + $0x3cc] ss:$16 sps:$4 sm:$0xff]  }
  0xa4   :  { %1558 = vmatprep.subr.bf16.mxu1 %v2989_v34  ;;  %v146_v34 = vpack.c.bf16 %v3597_v13, %v3597_v13  ;;  %v3086_v13 = vld [vmem:[#allocation5 + $0x440] ss:$16 sps:$4 sm:$0xff]  }
  0xa6   :  { %1550 = vmatmul.mubr.bf16.vlgmr.msra.gmra.mrb[4].mxu1 %v144_v24  ;;  %1399 = vmatpush1.bf16.msra.mxu0 %v2990_v35  ;;  %v3062_v24 = vld [vmem:[#allocation5 + $0x3c0] ss:$16 sps:$4 sm:$0xff]  }
  0xa7   :  { %1559 = vmatpush1.bf16.msra.mxu1 %v2987_v36  ;;  %1400 = vmatprep.subr.bf16.mxu0 %v2998_v37  ;;  %v3074_v35 = vld [vmem:[#allocation5 + $0x400] ss:$16 sps:$4 sm:$0xff]   ;;  %v149_v36 = vpack.c.bf16 %v136_v30, %v136_v30  ;;  %v3071_v37 = vld [vmem:[#allocation5 + $0x3c8] ss:$16 sps:$4 sm:$0xff]  }
  0xa8   :  { %1560 = vmatprep.subr.bf16.mxu1 %v2995_v12  ;;  %1590 = vmatprep.mubr.bf16.mxu1 %v147_v26  ;;  %v3070_v26 = vld [vmem:[#allocation5 + $0x3e4] ss:$16 sps:$4 sm:$0xff]   ;;  %v3149_v30 = vld [vmem:[#allocation5 + $0x568] ss:$16 sps:$4 sm:$0xff]  }
  0xa9   :  { %v3082_v12 = vld [vmem:[#allocation5 + $0x424] ss:$16 sps:$4 sm:$0xff]  }
  0xaa   :  { %1401 = vmatpush1.bf16.msra.mxu0 %v2996_v14  ;;  %v3079_v14 = vld [vmem:[#allocation5 + $0x3ec] ss:$16 sps:$4 sm:$0xff]  }
  0xab   :  { %1561 = vmatpush1.bf16.msra.mxu1 %v2993_v38  ;;  %1402 = vmatprep.subr.bf16.mxu0 %v3004_v39  ;;  %v3080_v38 = vld [vmem:[#allocation5 + $0x420] ss:$16 sps:$4 sm:$0xff]   ;;  %v3077_v39 = vld [vmem:[#allocation5 + $0x3e8] ss:$16 sps:$4 sm:$0xff]  }
  0xac   :  { %1562 = vmatprep.subr.bf16.mxu1 %v3001_v40  ;;  %v3088_v40 = vld [vmem:[#allocation5 + $0x444] ss:$16 sps:$4 sm:$0xff]  }
  0xae   :  { %1403 = vmatpush1.bf16.msra.mxu0 %v3002_v41  ;;  %v3085_v41 = vld [vmem:[#allocation5 + $0x40c] ss:$16 sps:$4 sm:$0xff]  }
  0xaf   :  { %1563 = vmatpush1.bf16.msra.mxu1 %v2999_v42  ;;  %1404 = vmatprep.subr.bf16.mxu0 %v3010_v43  ;;  %v3083_v42 = vld [vmem:[#allocation5 + $0x408] ss:$16 sps:$4 sm:$0xff]   ;;  %v3094_v43 = vld [vmem:[#allocation5 + $0x464] ss:$16 sps:$4 sm:$0xff]  }
  0xb0   :  { %1564 = vmatprep.subr.bf16.mxu1 %v3007_v44  ;;  %v3091_v44 = vld [vmem:[#allocation5 + $0x42c] ss:$16 sps:$4 sm:$0xff]  }
  0xb2   :  { %1405 = vmatpush1.bf16.msra.mxu0 %v3008_v45  ;;  %v3092_v45 = vld [vmem:[#allocation5 + $0x460] ss:$16 sps:$4 sm:$0xff]  }
  0xb3   :  { %1565 = vmatpush1.bf16.msra.mxu1 %v3005_v46  ;;  %1406 = vmatprep.subr.bf16.mxu0 %v3016_v47  ;;  %v3089_v46 = vld [vmem:[#allocation5 + $0x428] ss:$16 sps:$4 sm:$0xff]   ;;  %v3100_v47 = vld [vmem:[#allocation5 + $0x484] ss:$16 sps:$4 sm:$0xff]  }
  0xb4   :  { %1566 = vmatprep.subr.bf16.mxu1 %v3013_v48  ;;  %v3097_v48 = vld [vmem:[#allocation5 + $0x44c] ss:$16 sps:$4 sm:$0xff]  }
  0xb6   :  { %1407 = vmatpush1.bf16.msra.mxu0 %v3014_v49  ;;  %v3098_v49 = vld [vmem:[#allocation5 + $0x480] ss:$16 sps:$4 sm:$0xff]  }
  0xb7   :  { %1567 = vmatpush1.bf16.msra.mxu1 %v3011_v50  ;;  %1408 = vmatprep.subr.bf16.mxu0 %v3022_v51  ;;  %v3095_v50 = vld [vmem:[#allocation5 + $0x448] ss:$16 sps:$4 sm:$0xff]   ;;  %v3106_v51 = vld [vmem:[#allocation5 + $0x4a4] ss:$16 sps:$4 sm:$0xff]  }
  0xb8   :  { %1568 = vmatprep.subr.bf16.mxu1 %v3019_v52  ;;  %v3103_v52 = vld [vmem:[#allocation5 + $0x46c] ss:$16 sps:$4 sm:$0xff]  }
  0xba   :  { %1409 = vmatpush1.bf16.msra.mxu0 %v3020_v53  ;;  %v3101_v53 = vld [vmem:[#allocation5 + $0x468] ss:$16 sps:$4 sm:$0xff]  }
  0xbb   :  { %1569 = vmatpush1.bf16.msra.mxu1 %v3017_v54  ;;  %1410 = vmatprep.subr.bf16.mxu0 %v3028_v55  ;;  %v3104_v54 = vld [vmem:[#allocation5 + $0x4a0] ss:$16 sps:$4 sm:$0xff]   ;;  %v3109_v55 = vld [vmem:[#allocation5 + $0x48c] ss:$16 sps:$4 sm:$0xff]  }
  0xbc   :  { %1570 = vmatprep.subr.bf16.mxu1 %v3025_v56  ;;  %v3112_v56 = vld [vmem:[#allocation5 + $0x4c4] ss:$16 sps:$4 sm:$0xff]  }
  0xbe   :  { %1411 = vmatpush1.bf16.msra.mxu0 %v3026_v57  ;;  %v3110_v57 = vld [vmem:[#allocation5 + $0x4c0] ss:$16 sps:$4 sm:$0xff]  }
  0xbf   :  { %1571 = vmatpush1.bf16.msra.mxu1 %v3023_v58  ;;  %1412 = vmatprep.subr.bf16.mxu0 %v3034_v59  ;;  %v3107_v58 = vld [vmem:[#allocation5 + $0x488] ss:$16 sps:$4 sm:$0xff]   ;;  %v3118_v59 = vld [vmem:[#allocation5 + $0x4e4] ss:$16 sps:$4 sm:$0xff]  }
  0xc0   :  { %1572 = vmatprep.subr.bf16.mxu1 %v3031_v60  ;;  %v3115_v60 = vld [vmem:[#allocation5 + $0x4ac] ss:$16 sps:$4 sm:$0xff]  }
  0xc2   :  { %1413 = vmatpush1.bf16.msra.mxu0 %v3032_v61  ;;  %v3116_v61 = vld [vmem:[#allocation5 + $0x4e0] ss:$16 sps:$4 sm:$0xff]  }
  0xc3   :  { %1573 = vmatpush1.bf16.msra.mxu1 %v3029_v62  ;;  %1414 = vmatprep.subr.bf16.mxu0 %v3040_v63  ;;  %v3113_v62 = vld [vmem:[#allocation5 + $0x4a8] ss:$16 sps:$4 sm:$0xff]   ;;  %v3124_v63 = vld [vmem:[#allocation5 + $0x504] ss:$16 sps:$4 sm:$0xff]  }
  0xc4   :  { %1574 = vmatprep.subr.bf16.mxu1 %v3037_v1  ;;  %v3121_v1 = vld [vmem:[#allocation5 + $0x4cc] ss:$16 sps:$4 sm:$0xff]  }
  0xc6   :  { %1415 = vmatpush1.bf16.msra.mxu0 %v3038_v2  ;;  %v3122_v2 = vld [vmem:[#allocation5 + $0x500] ss:$16 sps:$4 sm:$0xff]  }
  0xc7   :  { %1575 = vmatpush1.bf16.msra.mxu1 %v3035_v4  ;;  %1416 = vmatprep.subr.bf16.mxu0 %v3046_v5  ;;  %v3119_v4 = vld [vmem:[#allocation5 + $0x4c8] ss:$16 sps:$4 sm:$0xff]   ;;  %v3130_v5 = vld [vmem:[#allocation5 + $0x524] ss:$16 sps:$4 sm:$0xff]  }
  0xc8   :  { %1576 = vmatprep.subr.bf16.mxu1 %v3043_v7  ;;  %v3127_v7 = vld [vmem:[#allocation5 + $0x4ec] ss:$16 sps:$4 sm:$0xff]  }
  0xca   :  { %1417 = vmatpush1.bf16.msra.mxu0 %v3044_v8  ;;  %v3128_v8 = vld [vmem:[#allocation5 + $0x520] ss:$16 sps:$4 sm:$0xff]  }
  0xcb   :  { %1577 = vmatpush1.bf16.msra.mxu1 %v3041_v9  ;;  %1418 = vmatprep.subr.bf16.mxu0 %v3052_v10  ;;  %v3125_v9 = vld [vmem:[#allocation5 + $0x4e8] ss:$16 sps:$4 sm:$0xff]   ;;  %v3136_v10 = vld [vmem:[#allocation5 + $0x544] ss:$16 sps:$4 sm:$0xff]  }
  0xcc   :  { %1578 = vmatprep.subr.bf16.mxu1 %v3049_v11  ;;  %v3133_v11 = vld [vmem:[#allocation5 + $0x50c] ss:$16 sps:$4 sm:$0xff]  }
  0xce   :  { %1419 = vmatpush1.bf16.msra.mxu0 %v3050_v15  ;;  %v3134_v15 = vld [vmem:[#allocation5 + $0x540] ss:$16 sps:$4 sm:$0xff]  }
  0xcf   :  { %1579 = vmatpush1.bf16.msra.mxu1 %v3047_v16  ;;  %1420 = vmatprep.subr.bf16.mxu0 %v3058_v17  ;;  %v3131_v16 = vld [vmem:[#allocation5 + $0x508] ss:$16 sps:$4 sm:$0xff]   ;;  %v3142_v17 = vld [vmem:[#allocation5 + $0x564] ss:$16 sps:$4 sm:$0xff]  }
  0xd0   :  { %1580 = vmatprep.subr.bf16.mxu1 %v3055_v18  ;;  %v3139_v18 = vld [vmem:[#allocation5 + $0x52c] ss:$16 sps:$4 sm:$0xff]  }
  0xd2   :  { %1421 = vmatpush1.bf16.msra.mxu0 %v3056_v19  ;;  %v3140_v19 = vld [vmem:[#allocation5 + $0x560] ss:$16 sps:$4 sm:$0xff]  }
  0xd3   :  { %1581 = vmatpush1.bf16.msra.mxu1 %v3053_v20  ;;  %1422 = vmatprep.subr.bf16.mxu0 %v3064_v22  ;;  %v3137_v20 = vld [vmem:[#allocation5 + $0x528] ss:$16 sps:$4 sm:$0xff]   ;;  %v3148_v22 = vld [vmem:[#allocation5 + $0x584] ss:$16 sps:$4 sm:$0xff]  }
  0xd4   :  { %1582 = vmatprep.subr.bf16.mxu1 %v3061_v23  ;;  %v3145_v23 = vld [vmem:[#allocation5 + $0x54c] ss:$16 sps:$4 sm:$0xff]  }
  0xd6   :  { %1423 = vmatpush1.bf16.msra.mxu0 %v3062_v24  ;;  %v3146_v24 = vld [vmem:[#allocation5 + $0x580] ss:$16 sps:$4 sm:$0xff]  }
  0xd7   :  { %1583 = vmatpush1.bf16.msra.mxu1 %v3059_v25  ;;  %1424 = vmatprep.subr.bf16.mxu0 %v3070_v26  ;;  %v3143_v25 = vld [vmem:[#allocation5 + $0x548] ss:$16 sps:$4 sm:$0xff]   ;;  %v3154_v26 = vld [vmem:[#allocation5 + $0x5a4] ss:$16 sps:$4 sm:$0xff]  }
  0xd8   :  { %1584 = vmatprep.subr.bf16.mxu1 %v3067_v27  ;;  %v3151_v27 = vld [vmem:[#allocation5 + $0x56c] ss:$16 sps:$4 sm:$0xff]  }
  0xda   :  { %1425 = vmatpush1.bf16.msra.mxu0 %v3068_v28  ;;  %v3152_v28 = vld [vmem:[#allocation5 + $0x5a0] ss:$16 sps:$4 sm:$0xff]  }
  0xdb   :  { %1585 = vmatpush1.bf16.msra.mxu1 %v3065_v31  ;;  %1435 = vmatprep.subr.bf16.mxu0 %v3076_v32  ;;  %v3160_v31 = vld [vmem:[#allocation5 + $0x5c4] ss:$16 sps:$4 sm:$0xff]   ;;  %v3157_v32 = vld [vmem:[#allocation5 + $0x58c] ss:$16 sps:$4 sm:$0xff]  }
  0xdc   :  { %1586 = vmatprep.subr.bf16.mxu1 %v3073_v33  ;;  %v3158_v33 = vld [vmem:[#allocation5 + $0x5c0] ss:$16 sps:$4 sm:$0xff]  }
  0xdd   :  { %1427 = vmatmul.mubr.bf16.vlgmr.msra.gmra.mrb[0].mxu0 %v146_v34 }
  0xde   :  { %1436 = vmatpush1.bf16.msra.mxu0 %v3074_v35  ;;  %1467 = vmatprep.mubr.bf16.mxu0 %v149_v36  ;;  %v3166_v35 = vld [vmem:[#allocation5 + $0x5e4] ss:$16 sps:$4 sm:$0xff]  }
  0xdf   :  { %1587 = vmatpush1.bf16.msra.mxu1 %v3071_v37  ;;  %1437 = vmatprep.subr.bf16.mxu0 %v3082_v12  ;;  %v3164_v37 = vld [vmem:[#allocation5 + $0x5e0] ss:$16 sps:$4 sm:$0xff]   ;;  %v3161_v12 = vld [vmem:[#allocation5 + $0x5a8] ss:$16 sps:$4 sm:$0xff]  }
  0xe0   :  { %1588 = vmatprep.subr.bf16.mxu1 %v3079_v14  ;;  %v3178_v14 = vld [vmem:[#allocation7 + $0x4] ss:$8 sps:$4 sm:$0xff]  }
  0xe2   :  { %1438 = vmatpush1.bf16.msra.mxu0 %v3080_v38  ;;  %v3169_v38 = vld [vmem:[#allocation5 + $0x5cc] ss:$16 sps:$4 sm:$0xff]  }
  0xe3   :  { %1589 = vmatpush1.bf16.msra.mxu1 %v3077_v39  ;;  %1439 = vmatprep.subr.bf16.mxu0 %v3088_v40  ;;  %v148_v39 = vpack.c.bf16 %v3603_v29, %v3603_v29  ;;  %v3176_v40 = vld [vmem:[#allocation7] ss:$8 sps:$4 sm:$0xff]  }
  0xe4   :  { %1599 = vmatprep.subr.bf16.mxu1 %v3085_v41  ;;  %v3167_v41 = vld [vmem:[#allocation5 + $0x5c8] ss:$16 sps:$4 sm:$0xff]  }
  0xe5   :  { %v3173_v29 = vld [vmem:[#allocation5 + $0x608] ss:$16 sps:$4 sm:$0xff]  }
  0xe6   :  { %1591 = vmatmul.mubr.bf16.vlgmr.msra.gmra.mrb[4].mxu1 %v146_v34  ;;  %1440 = vmatpush1.bf16.msra.mxu0 %v3086_v13  ;;  %v3155_v34 = vld [vmem:[#allocation5 + $0x588] ss:$16 sps:$4 sm:$0xff]   ;;  %v3181_v13 = vld [vmem:[#allocation7 + $0x14] ss:$8 sps:$4 sm:$0xff]  }
  0xe7   :  { %1600 = vmatpush1.bf16.msra.mxu1 %v3083_v42  ;;  %1441 = vmatprep.subr.bf16.mxu0 %v3094_v43  ;;  %v3172_v42 = vld [vmem:[#allocation5 + $0x5ec] ss:$16 sps:$4 sm:$0xff]   ;;  %v3179_v43 = vld [vmem:[#allocation7 + $0x10] ss:$8 sps:$4 sm:$0xff]  }
  0xe8   :  { %1601 = vmatprep.subr.bf16.mxu1 %v3091_v44  ;;  %1631 = vmatprep.mubr.bf16.mxu1 %v149_v36  ;;  %v3163_v36 = vld [vmem:[#allocation5 + $0x5ac] ss:$16 sps:$4 sm:$0xff]   ;;  %v3170_v44 = vld [vmem:[#allocation5 + $0x5e8] ss:$16 sps:$4 sm:$0xff]  }
  0xea   :  { %1442 = vmatpush1.bf16.msra.mxu0 %v3092_v45  ;;  %v3184_v45 = vld [vmem:[#allocation7 + $0x24] ss:$8 sps:$4 sm:$0xff]  }
  0xeb   :  { %1602 = vmatpush1.bf16.msra.mxu1 %v3089_v46  ;;  %1443 = vmatprep.subr.bf16.mxu0 %v3100_v47  ;;  %v3175_v46 = vld [vmem:[#allocation5 + $0x60c] ss:$16 sps:$4 sm:$0xff]   ;;  %v3182_v47 = vld [vmem:[#allocation7 + $0x20] ss:$8 sps:$4 sm:$0xff]  }
  0xec   :  { %1603 = vmatprep.subr.bf16.mxu1 %v3097_v48  ;;  %v3187_v48 = vld [vmem:[#allocation7 + $0x34] ss:$8 sps:$4 sm:$0xff]  }
  0xee   :  { %1444 = vmatpush1.bf16.msra.mxu0 %v3098_v49  ;;  %v3185_v49 = vld [vmem:[#allocation7 + $0x30] ss:$8 sps:$4 sm:$0xff]  }
  0xef   :  { %1604 = vmatpush1.bf16.msra.mxu1 %v3095_v50  ;;  %1445 = vmatprep.subr.bf16.mxu0 %v3106_v51  ;;  %v3190_v50 = vld [vmem:[#allocation7 + $0x44] ss:$8 sps:$4 sm:$0xff]   ;;  %v3188_v51 = vld [vmem:[#allocation7 + $0x40] ss:$8 sps:$4 sm:$0xff]  }
  0xf0   :  { %1605 = vmatprep.subr.bf16.mxu1 %v3103_v52  ;;  %v3193_v52 = vld [vmem:[#allocation7 + $0x54] ss:$8 sps:$4 sm:$0xff]  }
  0xf2   :  { %1446 = vmatpush1.bf16.msra.mxu0 %v3104_v54  ;;  %v3196_v54 = vld [vmem:[#allocation7 + $0x64] ss:$8 sps:$4 sm:$0xff]  }
  0xf3   :  { %1606 = vmatpush1.bf16.msra.mxu1 %v3101_v53  ;;  %1447 = vmatprep.subr.bf16.mxu0 %v3112_v56  ;;  %v3191_v53 = vld [vmem:[#allocation7 + $0x50] ss:$8 sps:$4 sm:$0xff]   ;;  %v3199_v56 = vld [vmem:[#allocation7 + $0x74] ss:$8 sps:$4 sm:$0xff]  }
  0xf4   :  { %1607 = vmatprep.subr.bf16.mxu1 %v3109_v55  ;;  %v3194_v55 = vld [vmem:[#allocation7 + $0x60] ss:$8 sps:$4 sm:$0xff]  }
  0xf6   :  { %1448 = vmatpush1.bf16.msra.mxu0 %v3110_v57  ;;  %v3197_v57 = vld [vmem:[#allocation7 + $0x70] ss:$8 sps:$4 sm:$0xff]  }
  0xf7   :  { %1608 = vmatpush1.bf16.msra.mxu1 %v3107_v58  ;;  %1449 = vmatprep.subr.bf16.mxu0 %v3118_v59 }
  0xf8   :  { %1609 = vmatprep.subr.bf16.mxu1 %v3115_v60  ;;  %v3200_v60 = vld [vmem:[#allocation7 + $0x80] ss:$8 sps:$4 sm:$0xff]  }
  0xfa   :  { %1450 = vmatpush1.bf16.msra.mxu0 %v3116_v61 }
  0xfb   :  { %1610 = vmatpush1.bf16.msra.mxu1 %v3113_v62  ;;  %1451 = vmatprep.subr.bf16.mxu0 %v3124_v63  ;;  %v3205_v62 = vld [vmem:[#allocation7 + $0x94] ss:$8 sps:$4 sm:$0xff]  }
  0xfc   :  { %1611 = vmatprep.subr.bf16.mxu1 %v3121_v1  ;;  %v3208_v1 = vld [vmem:[#allocation7 + $0xa4] ss:$8 sps:$4 sm:$0xff]  }
  0xfe   :  { %1452 = vmatpush1.bf16.msra.mxu0 %v3122_v2  ;;  %v3206_v2 = vld [vmem:[#allocation7 + $0xa0] ss:$8 sps:$4 sm:$0xff]  }
  0xff   :  { %1612 = vmatpush1.bf16.msra.mxu1 %v3119_v4  ;;  %1453 = vmatprep.subr.bf16.mxu0 %v3130_v5  ;;  %v3211_v4 = vld [vmem:[#allocation7 + $0xb4] ss:$8 sps:$4 sm:$0xff]   ;;  %v3209_v5 = vld [vmem:[#allocation7 + $0xb0] ss:$8 sps:$4 sm:$0xff]  }
 0x100   :  { %1613 = vmatprep.subr.bf16.mxu1 %v3127_v7  ;;  %v3214_v7 = vld [vmem:[#allocation7 + $0xc4] ss:$8 sps:$4 sm:$0xff]  }
 0x102   :  { %1454 = vmatpush1.bf16.msra.mxu0 %v3128_v8  ;;  %v3212_v8 = vld [vmem:[#allocation7 + $0xc0] ss:$8 sps:$4 sm:$0xff]  }
 0x103   :  { %1614 = vmatpush1.bf16.msra.mxu1 %v3125_v9  ;;  %1455 = vmatprep.subr.bf16.mxu0 %v3136_v10  ;;  %v3217_v9 = vld [vmem:[#allocation7 + $0xd4] ss:$8 sps:$4 sm:$0xff]   ;;  %v3215_v10 = vld [vmem:[#allocation7 + $0xd0] ss:$8 sps:$4 sm:$0xff]  }
 0x104   :  { %1615 = vmatprep.subr.bf16.mxu1 %v3133_v11  ;;  %v3220_v11 = vld [vmem:[#allocation7 + $0xe4] ss:$8 sps:$4 sm:$0xff]  }
 0x106   :  { %1456 = vmatpush1.bf16.msra.mxu0 %v3134_v15  ;;  %v3218_v15 = vld [vmem:[#allocation7 + $0xe0] ss:$8 sps:$4 sm:$0xff]  }
 0x107   :  { %1616 = vmatpush1.bf16.msra.mxu1 %v3131_v16  ;;  %1457 = vmatprep.subr.bf16.mxu0 %v3142_v17  ;;  %v3221_v16 = vld [vmem:[#allocation7 + $0xf0] ss:$8 sps:$4 sm:$0xff]   ;;  %v3223_v17 = vld [vmem:[#allocation7 + $0xf4] ss:$8 sps:$4 sm:$0xff]  }
 0x108   :  { %1617 = vmatprep.subr.bf16.mxu1 %v3139_v18  ;;  %v3226_v18 = vld [vmem:[#allocation7 + $0x104] ss:$8 sps:$4 sm:$0xff]  }
 0x10a   :  { %1458 = vmatpush1.bf16.msra.mxu0 %v3140_v19  ;;  %v3272_v19 = vld [vmem:[#allocation8 + $0x40] sm:$0xff]  }
 0x10b   :  { %1618 = vmatpush1.bf16.msra.mxu1 %v3137_v20  ;;  %1459 = vmatprep.subr.bf16.mxu0 %v3148_v22  ;;  %v3273_v20 = vld [vmem:[#allocation8] sm:$0xff]   ;;  %v3274_v22 = vld [vmem:[#allocation8 + $0x48] sm:$0xff]  }
 0x10c   :  { %1619 = vmatprep.subr.bf16.mxu1 %v3145_v23  ;;  %v3275_v23 = vld [vmem:[#allocation8 + $0x8] sm:$0xff]  }
 0x10e   :  { %1460 = vmatpush1.bf16.msra.mxu0 %v3146_v24  ;;  %v3276_v24 = vld [vmem:[#allocation8 + $0x50] sm:$0xff]  }
 0x10f   :  { %1620 = vmatpush1.bf16.msra.mxu1 %v3143_v25  ;;  %1461 = vmatprep.subr.bf16.mxu0 %v3154_v26  ;;  %v3277_v25 = vld [vmem:[#allocation8 + $0x10] sm:$0xff]   ;;  %v3278_v26 = vld [vmem:[#allocation8 + $0x58] sm:$0xff]  }
 0x110   :  { %1621 = vmatprep.subr.bf16.mxu1 %v3151_v27  ;;  %v3279_v27 = vld [vmem:[#allocation8 + $0x18] sm:$0xff]  }
 0x112   :  { %1462 = vmatpush1.bf16.msra.mxu0 %v3152_v28  ;;  %v3280_v28 = vld [vmem:[#allocation8 + $0x60] sm:$0xff]  }
 0x113   :  { %1622 = vmatpush1.bf16.msra.mxu1 %v3149_v30  ;;  %1463 = vmatprep.subr.bf16.mxu0 %v3160_v31  ;;  %v3281_v30 = vld [vmem:[#allocation8 + $0x20] sm:$0xff]   ;;  %v3282_v31 = vld [vmem:[#allocation8 + $0x68] sm:$0xff]  }
 0x114   :  { %1623 = vmatprep.subr.bf16.mxu1 %v3157_v32  ;;  %v3283_v32 = vld [vmem:[#allocation8 + $0x28] sm:$0xff]  }
 0x116   :  { %1464 = vmatpush1.bf16.msra.mxu0 %v3158_v33  ;;  %v351_v33 = vsub.s32 0, %v3581_v6 }
 0x117   :  { %1624 = vmatpush1.bf16.msra.mxu1 %v3155_v34  ;;  %1465 = vmatprep.subr.bf16.mxu0 %v3166_v35  ;;  %v3622_v34 = vld [vmem:[%s3665_s2] sm:$0xf]  ;;  %v355_v35 = vsub.s32 1, %v3581_v6 }
 0x118   :  { %1625 = vmatprep.subr.bf16.mxu1 %v3163_v36  ;;  %v352_v36 = vrot.slane %v3622_v34, %v351_v33 }
 0x11a   :  { %1466 = vmatpush1.bf16.msra.mxu0 %v3164_v37  ;;  %v356_v37 = vrot.slane %v3622_v34, %v355_v35 }
 0x11b   :  { %1626 = vmatpush1.bf16.msra.mxu1 %v3161_v12  ;;  %2085 = vmatprep.subr.bf16.mxu0 %v3178_v14 }
 0x11c   :  { %1627 = vmatprep.subr.bf16.mxu1 %v3169_v38 }
 0x11d   :  { %1468 = vmatmul.mubr.bf16.vlgmr.msra.gmra.mrb[0].mxu0 %v148_v39 }
 0x11e   :  { %2086 = vmatpush1.bf16.msra.mxu0 %v3176_v40 }
 0x11f   :  { %1628 = vmatpush1.bf16.msra.mxu1 %v3167_v41  ;;  %2087 = vmatprep.subr.bf16.mxu0 %v3181_v13 }
 0x120   :  { %1629 = vmatprep.subr.bf16.mxu1 %v3172_v42 }
 0x122   :  { %2088 = vmatpush1.bf16.msra.mxu0 %v3179_v43 }
 0x123   :  { %1630 = vmatpush1.bf16.msra.mxu1 %v3170_v44  ;;  %2089 = vmatprep.subr.bf16.mxu0 %v3184_v45 }
 0x124   :  { %1640 = vmatprep.subr.bf16.mxu1 %v3175_v46  ;;  %v3224_v46 = vld [vmem:[#allocation7 + $0x100] ss:$8 sps:$4 sm:$0xff]  }
 0x126   :  { %1632 = vmatmul.mubr.bf16.vlgmr.msra.gmra.mrb[4].mxu1 %v148_v39  ;;  %2090 = vmatpush1.bf16.msra.mxu0 %v3182_v47 }
 0x127   :  { %1641 = vmatpush1.bf16.msra.mxu1 %v3173_v29  ;;  %1672 = vmatprep.mubr.bf16.mxu1 %v3451_v0  ;;  %v3202_v0 = vld [vmem:[#allocation7 + $0x84] ss:$8 sps:$4 sm:$0xff]   ;;  %v3229_v29 = vld [vmem:[#allocation7 + $0x114] ss:$8 sps:$4 sm:$0xff]  }
 0x128   :  { %2091 = vmatprep.subr.bf16.mxu0 %v3187_v48  ;;  %2781 = vmatprep.subr.bf16.mxu1 %v3272_v19  ;;  %v3227_v48 = vld [vmem:[#allocation7 + $0x110] ss:$8 sps:$4 sm:$0xff]   ;;  %v3260_v19 = vld [vmem:[#allocation7 + $0x1c0] ss:$8 sps:$4 sm:$0xff]  }
 0x12a   :  { %2092 = vmatpush1.bf16.msra.mxu0 %v3185_v49  ;;  %v3232_v49 = vld [vmem:[#allocation7 + $0x124] ss:$8 sps:$4 sm:$0xff]  }
 0x12b   :  { %2093 = vmatprep.subr.bf16.mxu0 %v3190_v50  ;;  %v363_v50 = vsub.s32 3, %v3581_v6 }
 0x12e   :  { %2094 = vmatpush1.bf16.msra.mxu0 %v3188_v51  ;;  %v3230_v51 = vld [vmem:[#allocation7 + $0x120] ss:$8 sps:$4 sm:$0xff]  }
 0x12f   :  { %2095 = vmatprep.subr.bf16.mxu0 %v3193_v52  ;;  %v3235_v52 = vld [vmem:[#allocation7 + $0x134] ss:$8 sps:$4 sm:$0xff]  }
 0x132   :  { %2690 = vmatmul.mubr.msk.bf16.vlgmr.msra.gmra.mrb[4].mxu1 %vm1349_vm0, %v3591_v21  ;;  %2096 = vmatpush1.bf16.msra.mxu0 %v3191_v53  ;;  %v3203_v21 = vld [vmem:[#allocation7 + $0x90] ss:$8 sps:$4 sm:$0xff]   ;;  %v364_v53 = vrot.slane %v3622_v34, %v363_v50  ;;  %v3289_v50 = vld [vmem:[#allocation10 + $0x8] sm:$0xff]  }
 0x133   :  { %2097 = vmatprep.subr.bf16.mxu0 %v3196_v54  ;;  %2782 = vmatpush3.bf16.msra.mxu1 %v3273_v20  ;;  %v3233_v54 = vld [vmem:[#allocation7 + $0x130] ss:$8 sps:$4 sm:$0xff]   ;;  %v359_v20 = vsub.s32 2, %v3581_v6 }
 0x134   :  { %2783 = vmatprep.subr.bf16.mxu1 %v3274_v22  ;;  %v3265_v22 = vld [vmem:[#allocation7 + $0x1d4] ss:$8 sps:$4 sm:$0xff]  }
 0x135   :  { %v3291_v6 = vld [vmem:[#allocation10 + $0x18] sm:$0xff]  }
 0x136   :  { %2098 = vmatpush1.bf16.msra.mxu0 %v3194_v55 }
 0x137   :  { %2099 = vmatprep.subr.bf16.mxu0 %v3199_v56  ;;  %2784 = vmatpush3.bf16.msra.mxu1 %v3275_v23  ;;  %v3238_v56 = vld [vmem:[#allocation7 + $0x144] ss:$8 sps:$4 sm:$0xff]   ;;  %v3263_v23 = vld [vmem:[#allocation7 + $0x1d0] ss:$8 sps:$4 sm:$0xff]  }
 0x138   :  { %2785 = vmatprep.subr.bf16.mxu1 %v3276_v24  ;;  %v360_v24 = vrot.slane %v3622_v34, %v359_v20  ;;  %v3287_v34 = vld [vmem:[#allocation8 + $0x38] sm:$0xff]  }
 0x139   :  { %v3614_v58 = vpop.f32.mrb[0].mxu1 }
 0x13a   :  { %v3616_v59 = vpop.f32.mrb[1].mxu1  ;;  %2100 = vmatpush1.bf16.msra.mxu0 %v3197_v57 }
 0x13b   :  { %v1514_v61 = vpop.f32.mrb[2].mxu1  ;;  %2101 = vmatprep.subr.bf16.mxu0 %v3202_v0  ;;  %2786 = vmatpush3.bf16.msra.mxu1 %v3277_v25  ;;  %v3268_v25 = vld [vmem:[#allocation7 + $0x1e4] ss:$8 sps:$4 sm:$0xff]  }
 0x13c   :  { %v1515_v63 = vpop.f32.mrb[3].mxu1  ;;  %2787 = vmatprep.subr.bf16.mxu1 %v3278_v26  ;;  %v3266_v26 = vld [vmem:[#allocation7 + $0x1e0] ss:$8 sps:$4 sm:$0xff]  }
 0x13e   :  { %2102 = vmatpush1.bf16.msra.mxu0 %v3200_v60  ;;  %v3236_v60 = vld [vmem:[#allocation7 + $0x140] ss:$8 sps:$4 sm:$0xff]  }
 0x13f   :  { %2103 = vmatprep.subr.bf16.mxu0 %v3205_v62  ;;  %2788 = vmatpush3.bf16.msra.mxu1 %v3279_v27  ;;  %v3241_v62 = vld [vmem:[#allocation7 + $0x154] ss:$8 sps:$4 sm:$0xff]  }
 0x140   :  { %2789 = vmatprep.subr.bf16.mxu1 %v3280_v28  ;;  %v3271_v28 = vld [vmem:[#allocation7 + $0x1f4] ss:$8 sps:$4 sm:$0xff]  }
 0x142   :  { %2104 = vmatpush1.bf16.msra.mxu0 %v3203_v21  ;;  %v3239_v21 = vld [vmem:[#allocation7 + $0x150] ss:$8 sps:$4 sm:$0xff]  }
 0x143   :  { %2105 = vmatprep.subr.bf16.mxu0 %v3208_v1  ;;  %2790 = vmatpush3.bf16.msra.mxu1 %v3281_v30  ;;  %v3244_v1 = vld [vmem:[#allocation7 + $0x164] ss:$8 sps:$4 sm:$0xff]   ;;  %v3269_v30 = vld [vmem:[#allocation7 + $0x1f0] ss:$8 sps:$4 sm:$0xff]  }
 0x144   :  { %2791 = vmatprep.subr.bf16.mxu1 %v3282_v31 }
 0x146   :  { %2106 = vmatpush1.bf16.msra.mxu0 %v3206_v2  ;;  %v3242_v2 = vld [vmem:[#allocation7 + $0x160] ss:$8 sps:$4 sm:$0xff]  }
 0x147   :  { %2107 = vmatprep.subr.bf16.mxu0 %v3211_v4  ;;  %2792 = vmatpush3.bf16.msra.mxu1 %v3283_v32  ;;  %v3247_v4 = vld [vmem:[#allocation7 + $0x174] ss:$8 sps:$4 sm:$0xff]  }
 0x14a   :  { %2108 = vmatpush1.bf16.msra.mxu0 %v3209_v5  ;;  %v3245_v5 = vld [vmem:[#allocation7 + $0x170] ss:$8 sps:$4 sm:$0xff]  }
 0x14b   :  { %2109 = vmatprep.subr.bf16.mxu0 %v3214_v7  ;;  %v3250_v7 = vld [vmem:[#allocation7 + $0x184] ss:$8 sps:$4 sm:$0xff]  }
 0x14e   :  { %2110 = vmatpush1.bf16.msra.mxu0 %v3212_v8  ;;  %v3248_v8 = vld [vmem:[#allocation7 + $0x180] ss:$8 sps:$4 sm:$0xff]  }
 0x14f   :  { %2111 = vmatprep.subr.bf16.mxu0 %v3217_v9  ;;  %v3253_v9 = vld [vmem:[#allocation7 + $0x194] ss:$8 sps:$4 sm:$0xff]  }
 0x152   :  { %2112 = vmatpush1.bf16.msra.mxu0 %v3215_v10  ;;  %v3251_v10 = vld [vmem:[#allocation7 + $0x190] ss:$8 sps:$4 sm:$0xff]  }
 0x153   :  { %2113 = vmatprep.subr.bf16.mxu0 %v3220_v11  ;;  %v3256_v11 = vld [vmem:[#allocation7 + $0x1a4] ss:$8 sps:$4 sm:$0xff]  }
 0x156   :  { %2114 = vmatpush1.bf16.msra.mxu0 %v3218_v15  ;;  %v3254_v15 = vld [vmem:[#allocation7 + $0x1a0] ss:$8 sps:$4 sm:$0xff]  }
 0x157   :  { %2115 = vmatprep.subr.bf16.mxu0 %v3223_v17  ;;  %v3257_v17 = vld [vmem:[#allocation7 + $0x1b0] ss:$8 sps:$4 sm:$0xff]  }
 0x15a   :  { %2116 = vmatpush1.bf16.msra.mxu0 %v3221_v16  ;;  %v3259_v16 = vld [vmem:[#allocation7 + $0x1b4] ss:$8 sps:$4 sm:$0xff]  }
 0x15b   :  { %2126 = vmatprep.subr.bf16.mxu0 %v3226_v18  ;;  %v3262_v18 = vld [vmem:[#allocation7 + $0x1c4] ss:$8 sps:$4 sm:$0xff]  }
 0x1f0   :  { %v1469_v12 = vpop.f32.mrb[0].mxu0 }
 0x1f1   :  { %v2832_v14 = vadd.f32 %v1469_v12, %v352_v36  ;;  %v1471_v38 = vpop.f32.mrb[1].mxu0  ;;  %v3284_v36 = vld [vmem:[#allocation8 + $0x70] sm:$0xff]   ;;  %v3286_v12 = vld [vmem:[#allocation8 + $0x78] sm:$0xff]  }
 0x1f2   :  { %v2834_v39 = vadd.f32 %v1471_v38, %v356_v37  ;;  %v1473_v40 = vpop.f32.mrb[2].mxu0  ;;  %v3285_v37 = vld [vmem:[#allocation8 + $0x30] sm:$0xff]   ;;  %2793 = vmatprep.subr.bf16.mxu1 %v3284_v36 }
 0x1f3   :  { %v2833_v41 = vadd.f32 %v2832_v14, %v3614_v58  ;;  %v1474_v13 = vpop.f32.mrb[3].mxu0  ;;  %2794 = vmatpush3.bf16.msra.mxu1 %v3285_v37  ;;  %v3453_v14 = vmov 0.0   ;;  %v1753_v38 = vld [vmem:[%s3667_s4] sm:$0x3] }
 0x1f4   :  { %v2835_v42 = vadd.f32 %v2834_v39, %v3616_v59  ;;  %2795 = vmatprep.subr.bf16.mxu1 %v3286_v12  ;;  %v1758_v39 = vrot.slane %v1753_v38, %v351_v33  ;;  %v1762_v40 = vrot.slane %v1753_v38, %v355_v35  ;;  %v3290_v33 = vld [vmem:[#allocation10 + $0x10] sm:$0xff]   ;;  %v3292_v35 = vld [vmem:[#allocation10 + $0x20] sm:$0xff]  }
 0x1f5   :  { %v1681_v43 = vmax.f32 %v2833_v41, 0.0 }
 0x1f6   :  { %v1682_v44 = vmax.f32 %v2835_v42, 0.0 }
 0x1f7   :  { %v1685_v47 = vpack.c.bf16 %v1681_v43, %v1681_v43  ;;  %2796 = vmatpush3.bf16.msra.mxu1 %v3287_v34 }
 0x1f8   :  { %v1686_v45 = vpack.c.bf16 %v1682_v44, %v1682_v44  ;;  %2812 = vmatprep.subr.bf16.mxu1 %v3453_v14 }
 0x1fa   :  { %2117 = vmatprep.mubr.bf16.mxu0 %v1686_v45 }
 0x1fb   :  { %2118 = vmatmul.mubr.bf16.vlgmr.msra.gmra.mrb[4].mxu0 %v1685_v47 }
 0x1fc   :  { %2127 = vmatpush1.bf16.msra.mxu0 %v3224_v46 }
 0x1fd   :  { %2128 = vmatprep.subr.bf16.mxu0 %v3229_v29 }
 0x200   :  { %2129 = vmatpush1.bf16.msra.mxu0 %v3227_v48  ;;  %v3288_v48 = vld [vmem:[#allocation10] sm:$0xff]  }
 0x201   :  { %2130 = vmatprep.subr.bf16.mxu0 %v3232_v49 }
 0x204   :  { %2131 = vmatpush1.bf16.msra.mxu0 %v3230_v51  ;;  %v3293_v51 = vld [vmem:[#allocation10 + $0x28] sm:$0xff]  }
 0x205   :  { %v1674_v55 = vpop.f32.mrb[4].mxu1  ;;  %2132 = vmatprep.subr.bf16.mxu0 %v3235_v52  ;;  %v3294_v52 = vld [vmem:[#allocation10 + $0x30] sm:$0xff]  }
 0x206   :  { %v1676_v57 = vpop.f32.mrb[5].mxu1  ;;  %v2836_v27 = vadd.f32 %v1674_v55, %v360_v24  ;;  %v2755_v55 = vld [vmem:[%s3669_s6] ss:$0 sm:$0xff]  ;;  %s3455_s6 = smov [#allocation11]  }
 0x207   :  { %v2837_v0 = vadd.f32 %v1676_v57, %v364_v53  ;;  %v1678_v58 = vpop.f32.mrb[6].mxu1  ;;  %v3295_v53 = vld [vmem:[#allocation10 + $0x38] sm:$0xff]  }
 0x208   :  { %v1679_v59 = vpop.f32.mrb[7].mxu1  ;;  %2133 = vmatpush1.bf16.msra.mxu0 %v3233_v54  ;;  %v1683_v31 = vmax.f32 %v2836_v27, 0.0 }
 0x209   :  { %v1684_v61 = vmax.f32 %v2837_v0, 0.0  ;;  %2134 = vmatprep.subr.bf16.mxu0 %v3238_v56 }
 0x20a   :  { %v1687_v32 = vpack.c.bf16 %v1683_v31, %v1683_v31 }
 0x20b   :  { %v1688_v63 = vpack.c.bf16 %v1684_v61, %v1684_v61 }
 0x20c   :  { %2135 = vmatpush1.bf16.msra.mxu0 %v3236_v60 }
 0x20d   :  { %2158 = vmatprep.mubr.bf16.mxu0 %v1688_v63  ;;  %2136 = vmatprep.subr.bf16.mxu0 %v3241_v62  ;;  %v2460_v62 = vand.u32 127, %v108_v3  ;;  %v2772_v63 = vld [vmem:[%s3671_s8] ss:$0 sm:$0xff]  ;;  %s2482_s8 = sshll.u32 %s3455_s6, 4  ;;  %s2483_s8 = int_to_ptr.vmem [resolvable:$true] %s2482_s8 }
 0x20e   :  { %s3410_s12 = scalar_lea.vmem %s2483_s8, 32  ;;  %p3415_p13 = scmp.lt.s32.totalorder %s2483_s8, %s2483_s8 }
 0x20f   :  { %vm2461_vm2 = vcmp.lt.s32.totalorder %v2460_v62, 10  ;;  %p3411_p12 = scmp.ne.s32.totalorder %s2483_s8, %s3410_s12  ;;  %p3416_p0 = scmp.lt.s32.totalorder %s3410_s12, %s3410_s12 }
 0x210   :  { %2137 = vmatpush1.bf16.msra.mxu0 %v3239_v21 }
 0x211   :  { %2138 = vmatprep.subr.bf16.mxu0 %v3244_v1  ;;  %p3417_p1 = por %p3416_p0, %p3415_p13 }
 0x213   :  { %p3418_p2 = pnand %p3417_p1, %p3411_p12 }
 0x214   :  { %2139 = vmatpush1.bf16.msra.mxu0 %v3242_v2 }
 0x215   :  { %2140 = vmatprep.subr.bf16.mxu0 %v3247_v4 }
 0x218   :  { %2141 = vmatpush1.bf16.msra.mxu0 %v3245_v5 }
 0x219   :  { %2142 = vmatprep.subr.bf16.mxu0 %v3250_v7 }
 0x21c   :  { %2143 = vmatpush1.bf16.msra.mxu0 %v3248_v8 }
 0x21d   :  { %2144 = vmatprep.subr.bf16.mxu0 %v3253_v9 }
 0x220   :  { %2145 = vmatpush1.bf16.msra.mxu0 %v3251_v10 }
 0x221   :  { %2146 = vmatprep.subr.bf16.mxu0 %v3256_v11 }
 0x224   :  { %2147 = vmatpush1.bf16.msra.mxu0 %v3254_v15 }
 0x225   :  { %2148 = vmatprep.subr.bf16.mxu0 %v3259_v16 }
 0x228   :  { %2149 = vmatpush1.bf16.msra.mxu0 %v3257_v17 }
 0x229   :  { %2150 = vmatprep.subr.bf16.mxu0 %v3262_v18 }
 0x22c   :  { %2151 = vmatpush1.bf16.msra.mxu0 %v3260_v19 }
 0x22d   :  { %2152 = vmatprep.subr.bf16.mxu0 %v3265_v22 }
 0x230   :  { %2153 = vmatpush1.bf16.msra.mxu0 %v3263_v23 }
 0x231   :  { %2154 = vmatprep.subr.bf16.mxu0 %v3268_v25 }
 0x234   :  { %2155 = vmatpush1.bf16.msra.mxu0 %v3266_v26 }
 0x235   :  { %2156 = vmatprep.subr.bf16.mxu0 %v3271_v28 }
 0x238   :  { %2157 = vmatpush1.bf16.msra.mxu0 %v3269_v30 }
 0x23b   :  { %2159 = vmatmul.mubr.bf16.vlgmr.msra.gmra.mrb[4].mxu0 %v1687_v32 }
 0x30e   :  { %v2160_v41 = vpop.f32.mrb[4].mxu0 }
 0x30f   :  { %v2838_v13 = vadd.f32 %v2160_v41, %v1758_v39  ;;  %v2162_v42 = vpop.f32.mrb[5].mxu0 }
 0x310   :  { %v2839_v43 = vadd.f32 %v2162_v42, %v1762_v40  ;;  %v2164_v44 = vpop.f32.mrb[6].mxu0 }
 0x311   :  { %v2167_v45 = vmax.f32 %v2838_v13, 0.0  ;;  %v2165_v46 = vpop.f32.mrb[7].mxu0 }
 0x312   :  { %v2168_v47 = vmax.f32 %v2839_v43, 0.0 }
 0x313   :  { %v2169_v49 = vpack.c.bf16 %v2167_v45, %v2167_v45 }
 0x314   :  { %v2170_v29 = vpack.c.bf16 %v2168_v47, %v2168_v47 }
 0x316   :  { %2338 = vmatprep.mubr.bf16.mxu1 %v2170_v29 }
 0x317   :  { %2339 = vmatmul.mubr.bf16.vlgmr.msra.gmra.mrb[8].mxu1 %v2169_v49 }
 0x318   :  { %2813 = vmatpush3.bf16.msra.mxu1 %v3288_v48  ;;  %2828 = vmatprep.mubr.msk.bf16.mxu1 %vm3454_vm1, %v3453_v14 }
 0x319   :  { %2814 = vmatprep.subr.bf16.mxu1 %v3453_v14 }
 0x31c   :  { %2815 = vmatpush3.bf16.msra.mxu1 %v3289_v50 }
 0x31d   :  { %2816 = vmatprep.subr.bf16.mxu1 %v3453_v14 }
 0x320   :  { %2817 = vmatpush3.bf16.msra.mxu1 %v3290_v33 }
 0x321   :  { %2818 = vmatprep.subr.bf16.mxu1 %v3453_v14 }
 0x324   :  { %2819 = vmatpush3.bf16.msra.mxu1 %v3291_v6 }
 0x325   :  { %2820 = vmatprep.subr.bf16.mxu1 %v3453_v14 }
 0x328   :  { %2821 = vmatpush3.bf16.msra.mxu1 %v3292_v35 }
 0x329   :  { %2822 = vmatprep.subr.bf16.mxu1 %v3453_v14 }
 0x32c   :  { %2823 = vmatpush3.bf16.msra.mxu1 %v3293_v51 }
 0x32d   :  { %2824 = vmatprep.subr.bf16.mxu1 %v3453_v14 }
 0x330   :  { %2825 = vmatpush3.bf16.msra.mxu1 %v3294_v52 }
 0x331   :  { %2826 = vmatprep.subr.bf16.mxu1 %v3453_v14 }
 0x334   :  { %2827 = vmatpush3.bf16.msra.mxu1 %v3295_v53 }
 0x3ea   :  { %v2797_v54 = vpop.f32.mrb[8].mxu1 }
 0x3eb   :  { %v2798_v56 = vpop.f32.mrb[9].mxu1 }
 0x3ec   :  { %v2799_v57 = vadd.f32 %v2798_v56, %v2797_v54  ;;  %v2800_v0 = vpop.f32.mrb[10].mxu1 }
 0x3ed   :  { %v2801_v58 = vpop.f32.mrb[11].mxu1 }
 0x3ee   :  { %v2341_v59 = vadd.f32 %v2799_v57, %v2755_v55 }
 0x3f0   :  { %v2346_v60 = vmax.f32 %v2341_v59, 0.0 }
 0x3f2   :  { %v2347_v61 = vpack.c.bf16 %v2346_v60, %v2346_v60 }
 0x3f4   :  { %2829 = vmatmul.mubr.bf16.vlgmr.msra.gmra.mrb[12].mxu1 %v2347_v61 }
 0x4c7   :  { %v2453_v21 = vpop.f32.mrb[12].mxu1 }
 0x4c8   :  { %v2454_v1 = vadd.f32 %v2772_v63, %v2453_v21  ;;  %v2830_v2 = vpop.f32.mrb[13].mxu1 }
 0x4c9   :  { %v2456_v4 = vpop.f32.mrb[14].mxu1 }
 0x4ca   :  { %v2831_v5 = vpop.f32.mrb[15].mxu1  ;;  %v2462_v7 = vsel %vm2461_vm2, %v2454_v1, -inf }
 0x4cb   :  { %v2464_v8 = vsel %vm2463_vm3, %v2462_v7, -inf }
 0x4cc   :  { %2465 = vmax.xlane.f32.xlu0 %v2464_v8 }
 0x559   :  { %v2466_v9 = vpop.xlane.xlu0 %2465 }
 0x55a   :  { %v2467_v10 = vsub.f32 %v2462_v7, %v2466_v9 }
 0x55c   :  { %v2468_v11 = vmul.f32 1.442695, %v2467_v10 }
 0x55e   :  { %3296 = vpow2.f32 %v2468_v11 }
 0x568   :  { %v3297_v15 = vpop.eup %3296 }
 0x569   :  { %v2470_v3 = vsel %vm2463_vm3, %v3297_v15, 0.0 }
 0x56a   :  { %2471 = vadd.xlane.f32.xlu0 %v2470_v3 }
 0x5f7   :  { %v2472_v16 = vpop.xlane.xlu0 %2471 }
 0x5f8   :  { %3298 = vrcp.f32 %v2472_v16 }
 0x602   :  { %v3299_v17 = vpop.eup %3298 }
 0x603   :  { %v2474_v18 = vmul.f32 %v3299_v17, %v3297_v15 }
 0x605   :  { %2475 = vst [vmem:[#allocation11] sm:$0x3] %v2474_v18 }
 0x606   :  { %3421 = shalt.err (!%p3418_p2)
}
 0x607   :  { %s3422_s15 = scalar_lea.hbm %s3672_s9, 32 }
 0x608   :  { %p3423_p3 = scmp.ne.s32.totalorder %s3672_s9, %s3422_s15  ;;  %p3426_p4 = scmp.lt.u32.totalorder %s3422_s15, %s3672_s9 }
 0x60a   :  { %p3428_p5 = pnand %p3426_p4, %p3423_p3 }
 0x60c   :  { %3431 = shalt.err (!%p3428_p5)
}
 0x60d   :  { %2485 = dma.vmem_to_hbm [thread:$0]  %s2483_s8, 32, %s3672_s9, [#allocation4]  }
 0x60e   :  { %3438 = dma.done.wait [#allocation4], 32  }
 0x60f   :  { %3439 = vsyncadd [#allocation4], 4294967264 }
 0x610   :  { %2489 = vsyncpa [#allocation3], 1 }
 0x611   :  { %2490 = vsyncpa [#allocation6], 1 }
 0x612   :  { %2491 = vsyncpa [#allocation9], 1 }
 0x613   :  { %2492 = vsyncpa [#allocation4], 1 }

</bundles_post_ra>
